<compile_context>
chip_gen: v7x
topology: tpu7x:2x2x1
jax: 0.10.0
libtpu: 0.0.40
codegen_flags: <defaults>
</compile_context>

<pallas_src>
import math
import jax
import jax.numpy as jnp
from jax.experimental import pallas as pl
from jax.experimental.pallas import tpu as pltpu


# ----------------------------- in-kernel math ------------------------------

def _erf(x):
    # Abramowitz & Stegun 7.1.26 polynomial erf (max abs err ~1.5e-7) — built
    # only from exp/abs/where, all of which lower cleanly in Mosaic.  Matches
    # torch's exact GELU to fp32 precision.
    a1, a2, a3, a4, a5 = 0.254829592, -0.284496736, 1.421413741, -1.453152027, 1.061405429
    p = 0.3275911
    sign = jnp.where(x >= 0.0, 1.0, -1.0)
    ax = jnp.abs(x)
    t = 1.0 / (1.0 + p * ax)
    poly = ((((a5 * t + a4) * t + a3) * t + a2) * t + a1) * t
    return sign * (1.0 - poly * jnp.exp(-ax * ax))


def _gelu_exact(x):
    # matches torch.nn.GELU() default (approximate='none')
    return 0.5 * x * (1.0 + _erf(x * 0.7071067811865476))


# --------------------------- fused model kernel ----------------------------

def make_fused_gru_kernel(T, Bp, H, n_layers):
    """Fused kernel: n_layers of GRU over time (wavefronted) + Linear->GELU->Linear head.

    Ref order: x_tm, (wx, wh, bx, bhn) * n_layers, w1, b1, w2, b2, out
      x_tm : (T*Bp, D_in)  time-major, batch padded to Bp rows per step
      wx   : (D_in, 3H)    gate columns ordered [r | z | n] (torch order)
      wh   : (H, 3H)
      bx   : (1, 3H)       b_ih with b_hh's r,z columns folded in host-side
      bhn  : (1, H)        b_hh's n column (must stay inside the r* multiply)
    """
    H2, H3 = 2 * H, 3 * H

    def kernel(*refs):
        x_ref = refs[0]
        idx = 1
        layer_refs = []
        for _ in range(n_layers):
            layer_refs.append(refs[idx:idx + 4])
            idx += 4
        w1_ref, b1_ref, w2_ref, b2_ref = refs[idx:idx + 4]
        out_ref = refs[idx + 4]

        # ---- hoisted weight loads / bias broadcasts (off the recurrence chain) ----
        wxs, whs, bxs, bhnbs = [], [], [], []
        for (wx_ref, wh_ref, bx_ref, bhn_ref) in layer_refs:
            wxs.append(wx_ref[...])
            whs.append(wh_ref[...])
            bxs.append(bx_ref[...])
            # (1,H)->(Bp,H) broadcast hoisted: JAX does not CSE broadcast_in_dim.
            bhnbs.append(jnp.broadcast_to(bhn_ref[...], (Bp, H)))
        # per-step input-projection bias broadcasts for layers >= 1, hoisted
        bxbs = [None] + [jnp.broadcast_to(bxs[li], (Bp, H3)) for li in range(1, n_layers)]

        # ---- layer-0 non-recurrent input projection hoisted over ALL time steps ----
        gx0 = (jnp.dot(x_ref[...], wxs[0], preferred_element_type=jnp.float32)
               + bxs[0])                                        # (T*Bp, 3H)

        def gru_cell(gxt, h, wh, bhn_b):
            # gxt already contains b_ih (all gates) + b_hh (r,z gates, folded host-side)
            gh = jnp.dot(h, wh, preferred_element_type=jnp.float32)     # (Bp, 3H)
            rz = jax.nn.sigmoid(gxt[:, :H2] + gh[:, :H2])               # one EUP op for r|z
            r = rz[:, :H]
            z = rz[:, H:H2]
            n = jnp.tanh(gxt[:, H2:] + r * (gh[:, H2:] + bhn_b))
            return n + z * (h - n)                                      # == (1-z)*n + z*h

        # ---- wavefront over layers x time: stage s runs (layer l, step s-l) ----
        # All layer/step hidden states are SSA values (no VMEM scratch round-trip);
        # within one fully-unrolled basic block the LLO scheduler overlaps the
        # independent per-stage dots, giving the T + L - 1 critical path.
        h = [jnp.zeros((Bp, H), jnp.float32) for _ in range(n_layers)]
        produced = [[None] * T for _ in range(n_layers)]
        for s in range(T + n_layers - 1):
            for li in range(n_layers):
                t = s - li
                if t < 0 or t >= T:
                    continue
                if li == 0:
                    gxt = gx0[t * Bp:(t + 1) * Bp, :]           # 8-sublane-aligned slice
                else:
                    # input = previous layer's hidden at the same step (made one stage ago)
                    gxt = (jnp.dot(produced[li - 1][t], wxs[li],
                                   preferred_element_type=jnp.float32) + bxbs[li])
                h[li] = gru_cell(gxt, h[li], whs[li], bhnbs[li])
                produced[li][t] = h[li]

        # ---- projection head on the last hidden state of the last layer ----
        y = jnp.dot(h[n_layers - 1], w1_ref[...], preferred_element_type=jnp.float32) + b1_ref[...]
        y = _gelu_exact(y)
        o = jnp.dot(y, w2_ref[...], preferred_element_type=jnp.float32) + b2_ref[...]
        out_ref[...] = o.astype(out_ref.dtype)

    return kernel


# ------------------------------ full forward -------------------------------

def gru_model_forward(x, gru_params_raw, proj_params):
    """x: batch-first [B, T, enc_in] (PyTorch convention).

    gru_params_raw: list of (w_ih (3H,Din), w_hh (3H,H), b_ih (3H,), b_hh (3H,))
    proj_params:    (w1 (H,d_ff), b1 (1,d_ff), w2 (d_ff,c_out), b2 (1,c_out))
    """
    B, T, D_in = x.shape
    n_layers = len(gru_params_raw)
    H = gru_params_raw[0][1].shape[1]                 # w_hh: (3H, H)
    w1, b1, w2, b2 = proj_params
    d_ff = w1.shape[1]
    c_out = w2.shape[1]

    # Pad batch to the 8-sublane tile so every per-step slice/store in the
    # recurrence is a full, unmasked (8, *) tile.  Padded rows are zeros and
    # never influence the real rows (batch rows are independent everywhere).
    Bp = max(8, ((B + 7) // 8) * 8)

    # input Dropout / inter-layer GRU dropout are identity at inference.
    # batch-first -> time-major rows; the hoisted layer-0 input projection for
    # all time steps is then a single 2D matmul inside the kernel.
    x_tm = jnp.transpose(x, (1, 0, 2)).astype(jnp.float32)      # (T, B, D_in)
    if Bp != B:
        x_tm = jnp.pad(x_tm, ((0, 0), (0, Bp - B), (0, 0)))
    x_tm = x_tm.reshape(T * Bp, D_in)

    # Kernel-layout params: Wx=(Din,3H), Wh=(H,3H), gate columns [r|z|n].
    # Fold b_hh's r,z columns into the input bias (those adds commute); keep
    # b_hh's n column separate since it sits inside the r* multiply.
    flat = [x_tm]
    for (w_ih, w_hh, b_ih, b_hh) in gru_params_raw:
        wx = jnp.transpose(w_ih)                      # (in_dim, 3H)
        wh = jnp.transpose(w_hh)                      # (H, 3H)
        bx = (b_ih + jnp.concatenate([b_hh[:2 * H], jnp.zeros((H,), b_hh.dtype)])
              ).reshape(1, 3 * H)
        bhn = b_hh[2 * H:].reshape(1, H)
        flat.extend([wx, wh, bx, bhn])
    flat.extend([w1, b1, w2, b2])

    # advisory cost estimate for the XLA scheduler
    flops = 2 * T * Bp * D_in * 3 * H                 # layer-0 hoisted input proj
    flops += n_layers * 2 * T * Bp * H * 3 * H        # recurrent h @ Wh
    flops += (n_layers - 1) * 2 * T * Bp * H * 3 * H  # per-step input proj, layers >= 1
    flops += n_layers * 10 * T * Bp * H               # gate elementwise
    flops += 2 * Bp * H * d_ff + 2 * Bp * d_ff * c_out
    transcend = n_layers * 3 * T * Bp * H + Bp * d_ff
    bytes_accessed = 4 * (sum(int(a.size) for a in flat) + Bp * c_out)

    kernel = make_fused_gru_kernel(T=T, Bp=Bp, H=H, n_layers=n_layers)

    vmem_spec = pl.BlockSpec(memory_space=pltpu.MemorySpace.VMEM)
    out_padded = pl.pallas_call(
        kernel,
        out_shape=jax.ShapeDtypeStruct((Bp, c_out), jnp.float32),
        in_specs=[vmem_spec] * len(flat),
        out_specs=vmem_spec,
        cost_estimate=pl.CostEstimate(
            flops=int(flops),
            transcendentals=int(transcend),
            bytes_accessed=int(bytes_accessed)),
    )(*flat)
    return out_padded[:B]


# --------------------------- pure-JAX reference ----------------------------

def gru_model_reference(x, gru_params_raw, proj_params):
    B, T, _ = x.shape
    seq = x.astype(jnp.float32)
    for (w_ih, w_hh, b_ih, b_hh) in gru_params_raw:
        H = w_hh.shape[1]
        wx = jnp.transpose(w_ih)
        wh = jnp.transpose(w_hh)
        h = jnp.zeros((B, H), jnp.float32)
        outs = []
        for t in range(T):
            gx = seq[:, t, :] @ wx + b_ih
            gh = h @ wh + b_hh
            r = jax.nn.sigmoid(gx[:, :H] + gh[:, :H])
            z = jax.nn.sigmoid(gx[:, H:2 * H] + gh[:, H:2 * H])
            n = jnp.tanh(gx[:, 2 * H:] + r * gh[:, 2 * H:])
            h = (1.0 - z) * n + z * h
            outs.append(h)
        seq = jnp.stack(outs, axis=1)
    last = seq[:, -1]
    w1, b1, w2, b2 = proj_params
    y = last @ w1 + b1
    y = 0.5 * y * (1.0 + jax.scipy.special.erf(y / jnp.sqrt(2.0)))
    return y @ w2 + b2


# ------------------------------ param init ---------------------------------

def init_gru_layer_params(key, in_dim, hidden):
    """Synthetic init matching nn.GRU parameter shapes (torch layout)."""
    k = 1.0 / math.sqrt(hidden)
    ks = jax.random.split(key, 4)
    w_ih = jax.random.uniform(ks[0], (3 * hidden, in_dim), jnp.float32, -k, k)
    w_hh = jax.random.uniform(ks[1], (3 * hidden, hidden), jnp.float32, -k, k)
    b_ih = jax.random.uniform(ks[2], (3 * hidden,), jnp.float32, -k, k)
    b_hh = jax.random.uniform(ks[3], (3 * hidden,), jnp.float32, -k, k)
    return (w_ih, w_hh, b_ih, b_hh)


def init_linear_params(key, fan_in, fan_out):
    k = 1.0 / math.sqrt(fan_in)
    k1, k2 = jax.random.split(key)
    w = jax.random.uniform(k1, (fan_in, fan_out), jnp.float32, -k, k)
    b = jax.random.uniform(k2, (1, fan_out), jnp.float32, -k, k)
    return w, b


# --------------------------------- main -------------------------------------

if __name__ == "__main__":
    # configs: enc_in=4, c_out=4, d_model=32, e_layers=2, d_ff=64, dropout=0.1
    B, T = 2, 8
    enc_in, c_out, d_model, e_layers, d_ff = 4, 4, 32, 2, 64

    key = jax.random.PRNGKey(0)
    kx, kgru, kproj = jax.random.split(key, 3)

    # GRU stack parameters (torch layout)
    gru_params = []
    gkeys = jax.random.split(kgru, e_layers)
    for layer in range(e_layers):
        in_dim = enc_in if layer == 0 else d_model
        gru_params.append(init_gru_layer_params(gkeys[layer], in_dim, d_model))

    # projection head: Linear(d_model, d_ff) -> GELU -> Linear(d_ff, c_out)
    kp1, kp2 = jax.random.split(kproj)
    w1, b1 = init_linear_params(kp1, d_model, d_ff)
    w2, b2 = init_linear_params(kp2, d_ff, c_out)
    proj_params = (w1, b1, w2, b2)

    x = jax.random.normal(kx, (B, T, enc_in), jnp.float32)

    out = gru_model_forward(x, gru_params, proj_params)
    out = jax.block_until_ready(out)

    assert out.shape == (B, c_out), out.shape
    assert bool(jnp.all(jnp.isfinite(out)))

    # sanity check against a pure-JAX reference (loose tolerance: MXU f32
    # matmul precision differs slightly from XLA's default path)
    ref = jax.block_until_ready(gru_model_reference(x, gru_params, proj_params))
    assert bool(jnp.allclose(out, ref, rtol=5e-2, atol=5e-2))

    print("KERNEL_OK")
</pallas_src>

<mosaic_0001>
module attributes {stable_mosaic.version = 11 : i64} {
  func.func @kernel(%arg0: memref<64x4xf32, #tpu.memory_space<vmem>>, %arg1: memref<4x96xf32, #tpu.memory_space<vmem>>, %arg2: memref<32x96xf32, #tpu.memory_space<vmem>>, %arg3: memref<1x96xf32, #tpu.memory_space<vmem>>, %arg4: memref<1x32xf32, #tpu.memory_space<vmem>>, %arg5: memref<32x96xf32, #tpu.memory_space<vmem>>, %arg6: memref<32x96xf32, #tpu.memory_space<vmem>>, %arg7: memref<1x96xf32, #tpu.memory_space<vmem>>, %arg8: memref<1x32xf32, #tpu.memory_space<vmem>>, %arg9: memref<32x64xf32, #tpu.memory_space<vmem>>, %arg10: memref<1x64xf32, #tpu.memory_space<vmem>>, %arg11: memref<64x4xf32, #tpu.memory_space<vmem>>, %arg12: memref<1x4xf32, #tpu.memory_space<vmem>>, %arg13: memref<8x4xf32, #tpu.memory_space<vmem>>) attributes {dimension_semantics = [], scalar_prefetch = 0 : i64, scratch_operands = 0 : i64, tpu.core_type = #tpu.core_type<tc>} {
    %c0 = arith.constant 0 : index
    %c0_0 = arith.constant 0 : index
    %0 = vector.load %arg1[%c0, %c0_0] : memref<4x96xf32, #tpu.memory_space<vmem>>, vector<4x96xf32>
    %c0_1 = arith.constant 0 : index
    %c0_2 = arith.constant 0 : index
    %1 = vector.load %arg2[%c0_1, %c0_2] : memref<32x96xf32, #tpu.memory_space<vmem>>, vector<32x96xf32>
    %c0_3 = arith.constant 0 : index
    %c0_4 = arith.constant 0 : index
    %2 = vector.load %arg3[%c0_3, %c0_4] : memref<1x96xf32, #tpu.memory_space<vmem>>, vector<1x96xf32>
    %c0_5 = arith.constant 0 : index
    %c0_6 = arith.constant 0 : index
    %3 = vector.load %arg4[%c0_5, %c0_6] : memref<1x32xf32, #tpu.memory_space<vmem>>, vector<1x32xf32>
    %4 = vector.shape_cast %3 : vector<1x32xf32> to vector<1x32xf32>
    %5 = vector.broadcast %4 : vector<1x32xf32> to vector<8x32xf32>
    %c0_7 = arith.constant 0 : index
    %c0_8 = arith.constant 0 : index
    %6 = vector.load %arg5[%c0_7, %c0_8] : memref<32x96xf32, #tpu.memory_space<vmem>>, vector<32x96xf32>
    %c0_9 = arith.constant 0 : index
    %c0_10 = arith.constant 0 : index
    %7 = vector.load %arg6[%c0_9, %c0_10] : memref<32x96xf32, #tpu.memory_space<vmem>>, vector<32x96xf32>
    %c0_11 = arith.constant 0 : index
    %c0_12 = arith.constant 0 : index
    %8 = vector.load %arg7[%c0_11, %c0_12] : memref<1x96xf32, #tpu.memory_space<vmem>>, vector<1x96xf32>
    %c0_13 = arith.constant 0 : index
    %c0_14 = arith.constant 0 : index
    %9 = vector.load %arg8[%c0_13, %c0_14] : memref<1x32xf32, #tpu.memory_space<vmem>>, vector<1x32xf32>
    %10 = vector.shape_cast %9 : vector<1x32xf32> to vector<1x32xf32>
    %11 = vector.broadcast %10 : vector<1x32xf32> to vector<8x32xf32>
    %12 = vector.shape_cast %8 : vector<1x96xf32> to vector<1x96xf32>
    %13 = vector.broadcast %12 : vector<1x96xf32> to vector<8x96xf32>
    %c0_15 = arith.constant 0 : index
    %c0_16 = arith.constant 0 : index
    %14 = vector.load %arg0[%c0_15, %c0_16] : memref<64x4xf32, #tpu.memory_space<vmem>>, vector<64x4xf32>
    %cst = arith.constant dense<0.000000e+00> : vector<64x96xf32>
    %15 = tpu.matmul %14, %0, %cst {dimension_numbers = #tpu.dot_dimension_numbers<[1], [0], [0], [1], [0, 0, 1, 1], [], []>} : vector<64x4xf32>, vector<4x96xf32>, vector<64x96xf32> -> vector<64x96xf32>
    %16 = vector.broadcast %2 : vector<1x96xf32> to vector<64x96xf32>
    %17 = arith.addf %15, %16 : vector<64x96xf32>
    %cst_17 = arith.constant 0.000000e+00 : f32
    %18 = vector.broadcast %cst_17 : f32 to vector<8x32xf32>
    %cst_18 = arith.constant 0.000000e+00 : f32
    %19 = vector.broadcast %cst_18 : f32 to vector<8x32xf32>
    %20 = vector.extract_strided_slice %17 {offsets = [0, 0], sizes = [8, 96], strides = [1, 1]} : vector<64x96xf32> to vector<8x96xf32>
    %cst_19 = arith.constant dense<0.000000e+00> : vector<8x96xf32>
    %21 = tpu.matmul %18, %1, %cst_19 {dimension_numbers = #tpu.dot_dimension_numbers<[1], [0], [0], [1], [0, 0, 1, 1], [], []>} : vector<8x32xf32>, vector<32x96xf32>, vector<8x96xf32> -> vector<8x96xf32>
    %22 = vector.extract_strided_slice %20 {offsets = [0, 0], sizes = [8, 64], strides = [1, 1]} : vector<8x96xf32> to vector<8x64xf32>
    %23 = vector.extract_strided_slice %21 {offsets = [0, 0], sizes = [8, 64], strides = [1, 1]} : vector<8x96xf32> to vector<8x64xf32>
    %24 = arith.addf %22, %23 : vector<8x64xf32>
    %25 = arith.negf %24 : vector<8x64xf32>
    %26 = math.exp %25 : vector<8x64xf32>
    %cst_20 = arith.constant 1.000000e+00 : f32
    %27 = vector.broadcast %cst_20 : f32 to vector<8x64xf32>
    %28 = arith.addf %27, %26 : vector<8x64xf32>
    %29 = arith.divf %27, %28 : vector<8x64xf32>
    %30 = vector.extract_strided_slice %29 {offsets = [0, 0], sizes = [8, 32], strides = [1, 1]} : vector<8x64xf32> to vector<8x32xf32>
    %31 = vector.extract_strided_slice %29 {offsets = [0, 32], sizes = [8, 32], strides = [1, 1]} : vector<8x64xf32> to vector<8x32xf32>
    %32 = vector.extract_strided_slice %20 {offsets = [0, 64], sizes = [8, 32], strides = [1, 1]} : vector<8x96xf32> to vector<8x32xf32>
    %33 = vector.extract_strided_slice %21 {offsets = [0, 64], sizes = [8, 32], strides = [1, 1]} : vector<8x96xf32> to vector<8x32xf32>
    %34 = arith.addf %33, %5 : vector<8x32xf32>
    %35 = arith.mulf %30, %34 : vector<8x32xf32>
    %36 = arith.addf %32, %35 : vector<8x32xf32>
    %37 = math.tanh %36 : vector<8x32xf32>
    %38 = arith.subf %18, %37 : vector<8x32xf32>
    %39 = arith.mulf %31, %38 : vector<8x32xf32>
    %40 = arith.addf %37, %39 : vector<8x32xf32>
    %41 = vector.extract_strided_slice %17 {offsets = [8, 0], sizes = [8, 96], strides = [1, 1]} : vector<64x96xf32> to vector<8x96xf32>
    %cst_21 = arith.constant dense<0.000000e+00> : vector<8x96xf32>
    %42 = tpu.matmul %40, %1, %cst_21 {dimension_numbers = #tpu.dot_dimension_numbers<[1], [0], [0], [1], [0, 0, 1, 1], [], []>} : vector<8x32xf32>, vector<32x96xf32>, vector<8x96xf32> -> vector<8x96xf32>
    %43 = vector.extract_strided_slice %41 {offsets = [0, 0], sizes = [8, 64], strides = [1, 1]} : vector<8x96xf32> to vector<8x64xf32>
    %44 = vector.extract_strided_slice %42 {offsets = [0, 0], sizes = [8, 64], strides = [1, 1]} : vector<8x96xf32> to vector<8x64xf32>
    %45 = arith.addf %43, %44 : vector<8x64xf32>
    %46 = arith.negf %45 : vector<8x64xf32>
    %47 = math.exp %46 : vector<8x64xf32>
    %cst_22 = arith.constant 1.000000e+00 : f32
    %48 = vector.broadcast %cst_22 : f32 to vector<8x64xf32>
    %49 = arith.addf %48, %47 : vector<8x64xf32>
    %50 = arith.divf %48, %49 : vector<8x64xf32>
    %51 = vector.extract_strided_slice %50 {offsets = [0, 0], sizes = [8, 32], strides = [1, 1]} : vector<8x64xf32> to vector<8x32xf32>
    %52 = vector.extract_strided_slice %50 {offsets = [0, 32], sizes = [8, 32], strides = [1, 1]} : vector<8x64xf32> to vector<8x32xf32>
    %53 = vector.extract_strided_slice %41 {offsets = [0, 64], sizes = [8, 32], strides = [1, 1]} : vector<8x96xf32> to vector<8x32xf32>
    %54 = vector.extract_strided_slice %42 {offsets = [0, 64], sizes = [8, 32], strides = [1, 1]} : vector<8x96xf32> to vector<8x32xf32>
    %55 = arith.addf %54, %5 : vector<8x32xf32>
    %56 = arith.mulf %51, %55 : vector<8x32xf32>
    %57 = arith.addf %53, %56 : vector<8x32xf32>
    %58 = math.tanh %57 : vector<8x32xf32>
    %59 = arith.subf %40, %58 : vector<8x32xf32>
    %60 = arith.mulf %52, %59 : vector<8x32xf32>
    %61 = arith.addf %58, %60 : vector<8x32xf32>
    %cst_23 = arith.constant dense<0.000000e+00> : vector<8x96xf32>
    %62 = tpu.matmul %40, %6, %cst_23 {dimension_numbers = #tpu.dot_dimension_numbers<[1], [0], [0], [1], [0, 0, 1, 1], [], []>} : vector<8x32xf32>, vector<32x96xf32>, vector<8x96xf32> -> vector<8x96xf32>
    %63 = arith.addf %62, %13 : vector<8x96xf32>
    %cst_24 = arith.constant dense<0.000000e+00> : vector<8x96xf32>
    %64 = tpu.matmul %19, %7, %cst_24 {dimension_numbers = #tpu.dot_dimension_numbers<[1], [0], [0], [1], [0, 0, 1, 1], [], []>} : vector<8x32xf32>, vector<32x96xf32>, vector<8x96xf32> -> vector<8x96xf32>
    %65 = vector.extract_strided_slice %63 {offsets = [0, 0], sizes = [8, 64], strides = [1, 1]} : vector<8x96xf32> to vector<8x64xf32>
    %66 = vector.extract_strided_slice %64 {offsets = [0, 0], sizes = [8, 64], strides = [1, 1]} : vector<8x96xf32> to vector<8x64xf32>
    %67 = arith.addf %65, %66 : vector<8x64xf32>
    %68 = arith.negf %67 : vector<8x64xf32>
    %69 = math.exp %68 : vector<8x64xf32>
    %cst_25 = arith.constant 1.000000e+00 : f32
    %70 = vector.broadcast %cst_25 : f32 to vector<8x64xf32>
    %71 = arith.addf %70, %69 : vector<8x64xf32>
    %72 = arith.divf %70, %71 : vector<8x64xf32>
    %73 = vector.extract_strided_slice %72 {offsets = [0, 0], sizes = [8, 32], strides = [1, 1]} : vector<8x64xf32> to vector<8x32xf32>
    %74 = vector.extract_strided_slice %72 {offsets = [0, 32], sizes = [8, 32], strides = [1, 1]} : vector<8x64xf32> to vector<8x32xf32>
    %75 = vector.extract_strided_slice %63 {offsets = [0, 64], sizes = [8, 32], strides = [1, 1]} : vector<8x96xf32> to vector<8x32xf32>
    %76 = vector.extract_strided_slice %64 {offsets = [0, 64], sizes = [8, 32], strides = [1, 1]} : vector<8x96xf32> to vector<8x32xf32>
    %77 = arith.addf %76, %11 : vector<8x32xf32>
    %78 = arith.mulf %73, %77 : vector<8x32xf32>
    %79 = arith.addf %75, %78 : vector<8x32xf32>
    %80 = math.tanh %79 : vector<8x32xf32>
    %81 = arith.subf %19, %80 : vector<8x32xf32>
    %82 = arith.mulf %74, %81 : vector<8x32xf32>
    %83 = arith.addf %80, %82 : vector<8x32xf32>
    %84 = vector.extract_strided_slice %17 {offsets = [16, 0], sizes = [8, 96], strides = [1, 1]} : vector<64x96xf32> to vector<8x96xf32>
    %cst_26 = arith.constant dense<0.000000e+00> : vector<8x96xf32>
    %85 = tpu.matmul %61, %1, %cst_26 {dimension_numbers = #tpu.dot_dimension_numbers<[1], [0], [0], [1], [0, 0, 1, 1], [], []>} : vector<8x32xf32>, vector<32x96xf32>, vector<8x96xf32> -> vector<8x96xf32>
    %86 = vector.extract_strided_slice %84 {offsets = [0, 0], sizes = [8, 64], strides = [1, 1]} : vector<8x96xf32> to vector<8x64xf32>
    %87 = vector.extract_strided_slice %85 {offsets = [0, 0], sizes = [8, 64], strides = [1, 1]} : vector<8x96xf32> to vector<8x64xf32>
    %88 = arith.addf %86, %87 : vector<8x64xf32>
    %89 = arith.negf %88 : vector<8x64xf32>
    %90 = math.exp %89 : vector<8x64xf32>
    %cst_27 = arith.constant 1.000000e+00 : f32
    %91 = vector.broadcast %cst_27 : f32 to vector<8x64xf32>
    %92 = arith.addf %91, %90 : vector<8x64xf32>
    %93 = arith.divf %91, %92 : vector<8x64xf32>
    %94 = vector.extract_strided_slice %93 {offsets = [0, 0], sizes = [8, 32], strides = [1, 1]} : vector<8x64xf32> to vector<8x32xf32>
    %95 = vector.extract_strided_slice %93 {offsets = [0, 32], sizes = [8, 32], strides = [1, 1]} : vector<8x64xf32> to vector<8x32xf32>
    %96 = vector.extract_strided_slice %84 {offsets = [0, 64], sizes = [8, 32], strides = [1, 1]} : vector<8x96xf32> to vector<8x32xf32>
    %97 = vector.extract_strided_slice %85 {offsets = [0, 64], sizes = [8, 32], strides = [1, 1]} : vector<8x96xf32> to vector<8x32xf32>
    %98 = arith.addf %97, %5 : vector<8x32xf32>
    %99 = arith.mulf %94, %98 : vector<8x32xf32>
    %100 = arith.addf %96, %99 : vector<8x32xf32>
    %101 = math.tanh %100 : vector<8x32xf32>
    %102 = arith.subf %61, %101 : vector<8x32xf32>
    %103 = arith.mulf %95, %102 : vector<8x32xf32>
    %104 = arith.addf %101, %103 : vector<8x32xf32>
    %cst_28 = arith.constant dense<0.000000e+00> : vector<8x96xf32>
    %105 = tpu.matmul %61, %6, %cst_28 {dimension_numbers = #tpu.dot_dimension_numbers<[1], [0], [0], [1], [0, 0, 1, 1], [], []>} : vector<8x32xf32>, vector<32x96xf32>, vector<8x96xf32> -> vector<8x96xf32>
    %106 = arith.addf %105, %13 : vector<8x96xf32>
    %cst_29 = arith.constant dense<0.000000e+00> : vector<8x96xf32>
    %107 = tpu.matmul %83, %7, %cst_29 {dimension_numbers = #tpu.dot_dimension_numbers<[1], [0], [0], [1], [0, 0, 1, 1], [], []>} : vector<8x32xf32>, vector<32x96xf32>, vector<8x96xf32> -> vector<8x96xf32>
    %108 = vector.extract_strided_slice %106 {offsets = [0, 0], sizes = [8, 64], strides = [1, 1]} : vector<8x96xf32> to vector<8x64xf32>
    %109 = vector.extract_strided_slice %107 {offsets = [0, 0], sizes = [8, 64], strides = [1, 1]} : vector<8x96xf32> to vector<8x64xf32>
    %110 = arith.addf %108, %109 : vector<8x64xf32>
    %111 = arith.negf %110 : vector<8x64xf32>
    %112 = math.exp %111 : vector<8x64xf32>
    %cst_30 = arith.constant 1.000000e+00 : f32
    %113 = vector.broadcast %cst_30 : f32 to vector<8x64xf32>
    %114 = arith.addf %113, %112 : vector<8x64xf32>
    %115 = arith.divf %113, %114 : vector<8x64xf32>
    %116 = vector.extract_strided_slice %115 {offsets = [0, 0], sizes = [8, 32], strides = [1, 1]} : vector<8x64xf32> to vector<8x32xf32>
    %117 = vector.extract_strided_slice %115 {offsets = [0, 32], sizes = [8, 32], strides = [1, 1]} : vector<8x64xf32> to vector<8x32xf32>
    %118 = vector.extract_strided_slice %106 {offsets = [0, 64], sizes = [8, 32], strides = [1, 1]} : vector<8x96xf32> to vector<8x32xf32>
    %119 = vector.extract_strided_slice %107 {offsets = [0, 64], sizes = [8, 32], strides = [1, 1]} : vector<8x96xf32> to vector<8x32xf32>
    %120 = arith.addf %119, %11 : vector<8x32xf32>
    %121 = arith.mulf %116, %120 : vector<8x32xf32>
    %122 = arith.addf %118, %121 : vector<8x32xf32>
    %123 = math.tanh %122 : vector<8x32xf32>
    %124 = arith.subf %83, %123 : vector<8x32xf32>
    %125 = arith.mulf %117, %124 : vector<8x32xf32>
    %126 = arith.addf %123, %125 : vector<8x32xf32>
    %127 = vector.extract_strided_slice %17 {offsets = [24, 0], sizes = [8, 96], strides = [1, 1]} : vector<64x96xf32> to vector<8x96xf32>
    %cst_31 = arith.constant dense<0.000000e+00> : vector<8x96xf32>
    %128 = tpu.matmul %104, %1, %cst_31 {dimension_numbers = #tpu.dot_dimension_numbers<[1], [0], [0], [1], [0, 0, 1, 1], [], []>} : vector<8x32xf32>, vector<32x96xf32>, vector<8x96xf32> -> vector<8x96xf32>
    %129 = vector.extract_strided_slice %127 {offsets = [0, 0], sizes = [8, 64], strides = [1, 1]} : vector<8x96xf32> to vector<8x64xf32>
    %130 = vector.extract_strided_slice %128 {offsets = [0, 0], sizes = [8, 64], strides = [1, 1]} : vector<8x96xf32> to vector<8x64xf32>
    %131 = arith.addf %129, %130 : vector<8x64xf32>
    %132 = arith.negf %131 : vector<8x64xf32>
    %133 = math.exp %132 : vector<8x64xf32>
    %cst_32 = arith.constant 1.000000e+00 : f32
    %134 = vector.broadcast %cst_32 : f32 to vector<8x64xf32>
    %135 = arith.addf %134, %133 : vector<8x64xf32>
    %136 = arith.divf %134, %135 : vector<8x64xf32>
    %137 = vector.extract_strided_slice %136 {offsets = [0, 0], sizes = [8, 32], strides = [1, 1]} : vector<8x64xf32> to vector<8x32xf32>
    %138 = vector.extract_strided_slice %136 {offsets = [0, 32], sizes = [8, 32], strides = [1, 1]} : vector<8x64xf32> to vector<8x32xf32>
    %139 = vector.extract_strided_slice %127 {offsets = [0, 64], sizes = [8, 32], strides = [1, 1]} : vector<8x96xf32> to vector<8x32xf32>
    %140 = vector.extract_strided_slice %128 {offsets = [0, 64], sizes = [8, 32], strides = [1, 1]} : vector<8x96xf32> to vector<8x32xf32>
    %141 = arith.addf %140, %5 : vector<8x32xf32>
    %142 = arith.mulf %137, %141 : vector<8x32xf32>
    %143 = arith.addf %139, %142 : vector<8x32xf32>
    %144 = math.tanh %143 : vector<8x32xf32>
    %145 = arith.subf %104, %144 : vector<8x32xf32>
    %146 = arith.mulf %138, %145 : vector<8x32xf32>
    %147 = arith.addf %144, %146 : vector<8x32xf32>
    %cst_33 = arith.constant dense<0.000000e+00> : vector<8x96xf32>
    %148 = tpu.matmul %104, %6, %cst_33 {dimension_numbers = #tpu.dot_dimension_numbers<[1], [0], [0], [1], [0, 0, 1, 1], [], []>} : vector<8x32xf32>, vector<32x96xf32>, vector<8x96xf32> -> vector<8x96xf32>
    %149 = arith.addf %148, %13 : vector<8x96xf32>
    %cst_34 = arith.constant dense<0.000000e+00> : vector<8x96xf32>
    %150 = tpu.matmul %126, %7, %cst_34 {dimension_numbers = #tpu.dot_dimension_numbers<[1], [0], [0], [1], [0, 0, 1, 1], [], []>} : vector<8x32xf32>, vector<32x96xf32>, vector<8x96xf32> -> vector<8x96xf32>
    %151 = vector.extract_strided_slice %149 {offsets = [0, 0], sizes = [8, 64], strides = [1, 1]} : vector<8x96xf32> to vector<8x64xf32>
    %152 = vector.extract_strided_slice %150 {offsets = [0, 0], sizes = [8, 64], strides = [1, 1]} : vector<8x96xf32> to vector<8x64xf32>
    %153 = arith.addf %151, %152 : vector<8x64xf32>
    %154 = arith.negf %153 : vector<8x64xf32>
    %155 = math.exp %154 : vector<8x64xf32>
    %cst_35 = arith.constant 1.000000e+00 : f32
    %156 = vector.broadcast %cst_35 : f32 to vector<8x64xf32>
    %157 = arith.addf %156, %155 : vector<8x64xf32>
    %158 = arith.divf %156, %157 : vector<8x64xf32>
    %159 = vector.extract_strided_slice %158 {offsets = [0, 0], sizes = [8, 32], strides = [1, 1]} : vector<8x64xf32> to vector<8x32xf32>
    %160 = vector.extract_strided_slice %158 {offsets = [0, 32], sizes = [8, 32], strides = [1, 1]} : vector<8x64xf32> to vector<8x32xf32>
    %161 = vector.extract_strided_slice %149 {offsets = [0, 64], sizes = [8, 32], strides = [1, 1]} : vector<8x96xf32> to vector<8x32xf32>
    %162 = vector.extract_strided_slice %150 {offsets = [0, 64], sizes = [8, 32], strides = [1, 1]} : vector<8x96xf32> to vector<8x32xf32>
    %163 = arith.addf %162, %11 : vector<8x32xf32>
    %164 = arith.mulf %159, %163 : vector<8x32xf32>
    %165 = arith.addf %161, %164 : vector<8x32xf32>
    %166 = math.tanh %165 : vector<8x32xf32>
    %167 = arith.subf %126, %166 : vector<8x32xf32>
    %168 = arith.mulf %160, %167 : vector<8x32xf32>
    %169 = arith.addf %166, %168 : vector<8x32xf32>
    %170 = vector.extract_strided_slice %17 {offsets = [32, 0], sizes = [8, 96], strides = [1, 1]} : vector<64x96xf32> to vector<8x96xf32>
    %cst_36 = arith.constant dense<0.000000e+00> : vector<8x96xf32>
    %171 = tpu.matmul %147, %1, %cst_36 {dimension_numbers = #tpu.dot_dimension_numbers<[1], [0], [0], [1], [0, 0, 1, 1], [], []>} : vector<8x32xf32>, vector<32x96xf32>, vector<8x96xf32> -> vector<8x96xf32>
    %172 = vector.extract_strided_slice %170 {offsets = [0, 0], sizes = [8, 64], strides = [1, 1]} : vector<8x96xf32> to vector<8x64xf32>
    %173 = vector.extract_strided_slice %171 {offsets = [0, 0], sizes = [8, 64], strides = [1, 1]} : vector<8x96xf32> to vector<8x64xf32>
    %174 = arith.addf %172, %173 : vector<8x64xf32>
    %175 = arith.negf %174 : vector<8x64xf32>
    %176 = math.exp %175 : vector<8x64xf32>
    %cst_37 = arith.constant 1.000000e+00 : f32
    %177 = vector.broadcast %cst_37 : f32 to vector<8x64xf32>
    %178 = arith.addf %177, %176 : vector<8x64xf32>
    %179 = arith.divf %177, %178 : vector<8x64xf32>
    %180 = vector.extract_strided_slice %179 {offsets = [0, 0], sizes = [8, 32], strides = [1, 1]} : vector<8x64xf32> to vector<8x32xf32>
    %181 = vector.extract_strided_slice %179 {offsets = [0, 32], sizes = [8, 32], strides = [1, 1]} : vector<8x64xf32> to vector<8x32xf32>
    %182 = vector.extract_strided_slice %170 {offsets = [0, 64], sizes = [8, 32], strides = [1, 1]} : vector<8x96xf32> to vector<8x32xf32>
    %183 = vector.extract_strided_slice %171 {offsets = [0, 64], sizes = [8, 32], strides = [1, 1]} : vector<8x96xf32> to vector<8x32xf32>
    %184 = arith.addf %183, %5 : vector<8x32xf32>
    %185 = arith.mulf %180, %184 : vector<8x32xf32>
    %186 = arith.addf %182, %185 : vector<8x32xf32>
    %187 = math.tanh %186 : vector<8x32xf32>
    %188 = arith.subf %147, %187 : vector<8x32xf32>
    %189 = arith.mulf %181, %188 : vector<8x32xf32>
    %190 = arith.addf %187, %189 : vector<8x32xf32>
    %cst_38 = arith.constant dense<0.000000e+00> : vector<8x96xf32>
    %191 = tpu.matmul %147, %6, %cst_38 {dimension_numbers = #tpu.dot_dimension_numbers<[1], [0], [0], [1], [0, 0, 1, 1], [], []>} : vector<8x32xf32>, vector<32x96xf32>, vector<8x96xf32> -> vector<8x96xf32>
    %192 = arith.addf %191, %13 : vector<8x96xf32>
    %cst_39 = arith.constant dense<0.000000e+00> : vector<8x96xf32>
    %193 = tpu.matmul %169, %7, %cst_39 {dimension_numbers = #tpu.dot_dimension_numbers<[1], [0], [0], [1], [0, 0, 1, 1], [], []>} : vector<8x32xf32>, vector<32x96xf32>, vector<8x96xf32> -> vector<8x96xf32>
    %194 = vector.extract_strided_slice %192 {offsets = [0, 0], sizes = [8, 64], strides = [1, 1]} : vector<8x96xf32> to vector<8x64xf32>
    %195 = vector.extract_strided_slice %193 {offsets = [0, 0], sizes = [8, 64], strides = [1, 1]} : vector<8x96xf32> to vector<8x64xf32>
    %196 = arith.addf %194, %195 : vector<8x64xf32>
    %197 = arith.negf %196 : vector<8x64xf32>
    %198 = math.exp %197 : vector<8x64xf32>
    %cst_40 = arith.constant 1.000000e+00 : f32
    %199 = vector.broadcast %cst_40 : f32 to vector<8x64xf32>
    %200 = arith.addf %199, %198 : vector<8x64xf32>
    %201 = arith.divf %199, %200 : vector<8x64xf32>
    %202 = vector.extract_strided_slice %201 {offsets = [0, 0], sizes = [8, 32], strides = [1, 1]} : vector<8x64xf32> to vector<8x32xf32>
    %203 = vector.extract_strided_slice %201 {offsets = [0, 32], sizes = [8, 32], strides = [1, 1]} : vector<8x64xf32> to vector<8x32xf32>
    %204 = vector.extract_strided_slice %192 {offsets = [0, 64], sizes = [8, 32], strides = [1, 1]} : vector<8x96xf32> to vector<8x32xf32>
    %205 = vector.extract_strided_slice %193 {offsets = [0, 64], sizes = [8, 32], strides = [1, 1]} : vector<8x96xf32> to vector<8x32xf32>
    %206 = arith.addf %205, %11 : vector<8x32xf32>
    %207 = arith.mulf %202, %206 : vector<8x32xf32>
    %208 = arith.addf %204, %207 : vector<8x32xf32>
    %209 = math.tanh %208 : vector<8x32xf32>
    %210 = arith.subf %169, %209 : vector<8x32xf32>
    %211 = arith.mulf %203, %210 : vector<8x32xf32>
    %212 = arith.addf %209, %211 : vector<8x32xf32>
    %213 = vector.extract_strided_slice %17 {offsets = [40, 0], sizes = [8, 96], strides = [1, 1]} : vector<64x96xf32> to vector<8x96xf32>
    %cst_41 = arith.constant dense<0.000000e+00> : vector<8x96xf32>
    %214 = tpu.matmul %190, %1, %cst_41 {dimension_numbers = #tpu.dot_dimension_numbers<[1], [0], [0], [1], [0, 0, 1, 1], [], []>} : vector<8x32xf32>, vector<32x96xf32>, vector<8x96xf32> -> vector<8x96xf32>
    %215 = vector.extract_strided_slice %213 {offsets = [0, 0], sizes = [8, 64], strides = [1, 1]} : vector<8x96xf32> to vector<8x64xf32>
    %216 = vector.extract_strided_slice %214 {offsets = [0, 0], sizes = [8, 64], strides = [1, 1]} : vector<8x96xf32> to vector<8x64xf32>
    %217 = arith.addf %215, %216 : vector<8x64xf32>
    %218 = arith.negf %217 : vector<8x64xf32>
    %219 = math.exp %218 : vector<8x64xf32>
    %cst_42 = arith.constant 1.000000e+00 : f32
    %220 = vector.broadcast %cst_42 : f32 to vector<8x64xf32>
    %221 = arith.addf %220, %219 : vector<8x64xf32>
    %222 = arith.divf %220, %221 : vector<8x64xf32>
    %223 = vector.extract_strided_slice %222 {offsets = [0, 0], sizes = [8, 32], strides = [1, 1]} : vector<8x64xf32> to vector<8x32xf32>
    %224 = vector.extract_strided_slice %222 {offsets = [0, 32], sizes = [8, 32], strides = [1, 1]} : vector<8x64xf32> to vector<8x32xf32>
    %225 = vector.extract_strided_slice %213 {offsets = [0, 64], sizes = [8, 32], strides = [1, 1]} : vector<8x96xf32> to vector<8x32xf32>
    %226 = vector.extract_strided_slice %214 {offsets = [0, 64], sizes = [8, 32], strides = [1, 1]} : vector<8x96xf32> to vector<8x32xf32>
    %227 = arith.addf %226, %5 : vector<8x32xf32>
    %228 = arith.mulf %223, %227 : vector<8x32xf32>
    %229 = arith.addf %225, %228 : vector<8x32xf32>
    %230 = math.tanh %229 : vector<8x32xf32>
    %231 = arith.subf %190, %230 : vector<8x32xf32>
    %232 = arith.mulf %224, %231 : vector<8x32xf32>
    %233 = arith.addf %230, %232 : vector<8x32xf32>
    %cst_43 = arith.constant dense<0.000000e+00> : vector<8x96xf32>
    %234 = tpu.matmul %190, %6, %cst_43 {dimension_numbers = #tpu.dot_dimension_numbers<[1], [0], [0], [1], [0, 0, 1, 1], [], []>} : vector<8x32xf32>, vector<32x96xf32>, vector<8x96xf32> -> vector<8x96xf32>
    %235 = arith.addf %234, %13 : vector<8x96xf32>
    %cst_44 = arith.constant dense<0.000000e+00> : vector<8x96xf32>
    %236 = tpu.matmul %212, %7, %cst_44 {dimension_numbers = #tpu.dot_dimension_numbers<[1], [0], [0], [1], [0, 0, 1, 1], [], []>} : vector<8x32xf32>, vector<32x96xf32>, vector<8x96xf32> -> vector<8x96xf32>
    %237 = vector.extract_strided_slice %235 {offsets = [0, 0], sizes = [8, 64], strides = [1, 1]} : vector<8x96xf32> to vector<8x64xf32>
    %238 = vector.extract_strided_slice %236 {offsets = [0, 0], sizes = [8, 64], strides = [1, 1]} : vector<8x96xf32> to vector<8x64xf32>
    %239 = arith.addf %237, %238 : vector<8x64xf32>
    %240 = arith.negf %239 : vector<8x64xf32>
    %241 = math.exp %240 : vector<8x64xf32>
    %cst_45 = arith.constant 1.000000e+00 : f32
    %242 = vector.broadcast %cst_45 : f32 to vector<8x64xf32>
    %243 = arith.addf %242, %241 : vector<8x64xf32>
    %244 = arith.divf %242, %243 : vector<8x64xf32>
    %245 = vector.extract_strided_slice %244 {offsets = [0, 0], sizes = [8, 32], strides = [1, 1]} : vector<8x64xf32> to vector<8x32xf32>
    %246 = vector.extract_strided_slice %244 {offsets = [0, 32], sizes = [8, 32], strides = [1, 1]} : vector<8x64xf32> to vector<8x32xf32>
    %247 = vector.extract_strided_slice %235 {offsets = [0, 64], sizes = [8, 32], strides = [1, 1]} : vector<8x96xf32> to vector<8x32xf32>
    %248 = vector.extract_strided_slice %236 {offsets = [0, 64], sizes = [8, 32], strides = [1, 1]} : vector<8x96xf32> to vector<8x32xf32>
    %249 = arith.addf %248, %11 : vector<8x32xf32>
    %250 = arith.mulf %245, %249 : vector<8x32xf32>
    %251 = arith.addf %247, %250 : vector<8x32xf32>
    %252 = math.tanh %251 : vector<8x32xf32>
    %253 = arith.subf %212, %252 : vector<8x32xf32>
    %254 = arith.mulf %246, %253 : vector<8x32xf32>
    %255 = arith.addf %252, %254 : vector<8x32xf32>
    %256 = vector.extract_strided_slice %17 {offsets = [48, 0], sizes = [8, 96], strides = [1, 1]} : vector<64x96xf32> to vector<8x96xf32>
    %cst_46 = arith.constant dense<0.000000e+00> : vector<8x96xf32>
    %257 = tpu.matmul %233, %1, %cst_46 {dimension_numbers = #tpu.dot_dimension_numbers<[1], [0], [0], [1], [0, 0, 1, 1], [], []>} : vector<8x32xf32>, vector<32x96xf32>, vector<8x96xf32> -> vector<8x96xf32>
    %258 = vector.extract_strided_slice %256 {offsets = [0, 0], sizes = [8, 64], strides = [1, 1]} : vector<8x96xf32> to vector<8x64xf32>
    %259 = vector.extract_strided_slice %257 {offsets = [0, 0], sizes = [8, 64], strides = [1, 1]} : vector<8x96xf32> to vector<8x64xf32>
    %260 = arith.addf %258, %259 : vector<8x64xf32>
    %261 = arith.negf %260 : vector<8x64xf32>
    %262 = math.exp %261 : vector<8x64xf32>
    %cst_47 = arith.constant 1.000000e+00 : f32
    %263 = vector.broadcast %cst_47 : f32 to vector<8x64xf32>
    %264 = arith.addf %263, %262 : vector<8x64xf32>
    %265 = arith.divf %263, %264 : vector<8x64xf32>
    %266 = vector.extract_strided_slice %265 {offsets = [0, 0], sizes = [8, 32], strides = [1, 1]} : vector<8x64xf32> to vector<8x32xf32>
    %267 = vector.extract_strided_slice %265 {offsets = [0, 32], sizes = [8, 32], strides = [1, 1]} : vector<8x64xf32> to vector<8x32xf32>
    %268 = vector.extract_strided_slice %256 {offsets = [0, 64], sizes = [8, 32], strides = [1, 1]} : vector<8x96xf32> to vector<8x32xf32>
    %269 = vector.extract_strided_slice %257 {offsets = [0, 64], sizes = [8, 32], strides = [1, 1]} : vector<8x96xf32> to vector<8x32xf32>
    %270 = arith.addf %269, %5 : vector<8x32xf32>
    %271 = arith.mulf %266, %270 : vector<8x32xf32>
    %272 = arith.addf %268, %271 : vector<8x32xf32>
    %273 = math.tanh %272 : vector<8x32xf32>
    %274 = arith.subf %233, %273 : vector<8x32xf32>
    %275 = arith.mulf %267, %274 : vector<8x32xf32>
    %276 = arith.addf %273, %275 : vector<8x32xf32>
    %cst_48 = arith.constant dense<0.000000e+00> : vector<8x96xf32>
    %277 = tpu.matmul %233, %6, %cst_48 {dimension_numbers = #tpu.dot_dimension_numbers<[1], [0], [0], [1], [0, 0, 1, 1], [], []>} : vector<8x32xf32>, vector<32x96xf32>, vector<8x96xf32> -> vector<8x96xf32>
    %278 = arith.addf %277, %13 : vector<8x96xf32>
    %cst_49 = arith.constant dense<0.000000e+00> : vector<8x96xf32>
    %279 = tpu.matmul %255, %7, %cst_49 {dimension_numbers = #tpu.dot_dimension_numbers<[1], [0], [0], [1], [0, 0, 1, 1], [], []>} : vector<8x32xf32>, vector<32x96xf32>, vector<8x96xf32> -> vector<8x96xf32>
    %280 = vector.extract_strided_slice %278 {offsets = [0, 0], sizes = [8, 64], strides = [1, 1]} : vector<8x96xf32> to vector<8x64xf32>
    %281 = vector.extract_strided_slice %279 {offsets = [0, 0], sizes = [8, 64], strides = [1, 1]} : vector<8x96xf32> to vector<8x64xf32>
    %282 = arith.addf %280, %281 : vector<8x64xf32>
    %283 = arith.negf %282 : vector<8x64xf32>
    %284 = math.exp %283 : vector<8x64xf32>
    %cst_50 = arith.constant 1.000000e+00 : f32
    %285 = vector.broadcast %cst_50 : f32 to vector<8x64xf32>
    %286 = arith.addf %285, %284 : vector<8x64xf32>
    %287 = arith.divf %285, %286 : vector<8x64xf32>
    %288 = vector.extract_strided_slice %287 {offsets = [0, 0], sizes = [8, 32], strides = [1, 1]} : vector<8x64xf32> to vector<8x32xf32>
    %289 = vector.extract_strided_slice %287 {offsets = [0, 32], sizes = [8, 32], strides = [1, 1]} : vector<8x64xf32> to vector<8x32xf32>
    %290 = vector.extract_strided_slice %278 {offsets = [0, 64], sizes = [8, 32], strides = [1, 1]} : vector<8x96xf32> to vector<8x32xf32>
    %291 = vector.extract_strided_slice %279 {offsets = [0, 64], sizes = [8, 32], strides = [1, 1]} : vector<8x96xf32> to vector<8x32xf32>
    %292 = arith.addf %291, %11 : vector<8x32xf32>
    %293 = arith.mulf %288, %292 : vector<8x32xf32>
    %294 = arith.addf %290, %293 : vector<8x32xf32>
    %295 = math.tanh %294 : vector<8x32xf32>
    %296 = arith.subf %255, %295 : vector<8x32xf32>
    %297 = arith.mulf %289, %296 : vector<8x32xf32>
    %298 = arith.addf %295, %297 : vector<8x32xf32>
    %299 = vector.extract_strided_slice %17 {offsets = [56, 0], sizes = [8, 96], strides = [1, 1]} : vector<64x96xf32> to vector<8x96xf32>
    %cst_51 = arith.constant dense<0.000000e+00> : vector<8x96xf32>
    %300 = tpu.matmul %276, %1, %cst_51 {dimension_numbers = #tpu.dot_dimension_numbers<[1], [0], [0], [1], [0, 0, 1, 1], [], []>} : vector<8x32xf32>, vector<32x96xf32>, vector<8x96xf32> -> vector<8x96xf32>
    %301 = vector.extract_strided_slice %299 {offsets = [0, 0], sizes = [8, 64], strides = [1, 1]} : vector<8x96xf32> to vector<8x64xf32>
    %302 = vector.extract_strided_slice %300 {offsets = [0, 0], sizes = [8, 64], strides = [1, 1]} : vector<8x96xf32> to vector<8x64xf32>
    %303 = arith.addf %301, %302 : vector<8x64xf32>
    %304 = arith.negf %303 : vector<8x64xf32>
    %305 = math.exp %304 : vector<8x64xf32>
    %cst_52 = arith.constant 1.000000e+00 : f32
    %306 = vector.broadcast %cst_52 : f32 to vector<8x64xf32>
    %307 = arith.addf %306, %305 : vector<8x64xf32>
    %308 = arith.divf %306, %307 : vector<8x64xf32>
    %309 = vector.extract_strided_slice %308 {offsets = [0, 0], sizes = [8, 32], strides = [1, 1]} : vector<8x64xf32> to vector<8x32xf32>
    %310 = vector.extract_strided_slice %308 {offsets = [0, 32], sizes = [8, 32], strides = [1, 1]} : vector<8x64xf32> to vector<8x32xf32>
    %311 = vector.extract_strided_slice %299 {offsets = [0, 64], sizes = [8, 32], strides = [1, 1]} : vector<8x96xf32> to vector<8x32xf32>
    %312 = vector.extract_strided_slice %300 {offsets = [0, 64], sizes = [8, 32], strides = [1, 1]} : vector<8x96xf32> to vector<8x32xf32>
    %313 = arith.addf %312, %5 : vector<8x32xf32>
    %314 = arith.mulf %309, %313 : vector<8x32xf32>
    %315 = arith.addf %311, %314 : vector<8x32xf32>
    %316 = math.tanh %315 : vector<8x32xf32>
    %317 = arith.subf %276, %316 : vector<8x32xf32>
    %318 = arith.mulf %310, %317 : vector<8x32xf32>
    %319 = arith.addf %316, %318 : vector<8x32xf32>
    %cst_53 = arith.constant dense<0.000000e+00> : vector<8x96xf32>
    %320 = tpu.matmul %276, %6, %cst_53 {dimension_numbers = #tpu.dot_dimension_numbers<[1], [0], [0], [1], [0, 0, 1, 1], [], []>} : vector<8x32xf32>, vector<32x96xf32>, vector<8x96xf32> -> vector<8x96xf32>
    %321 = arith.addf %320, %13 : vector<8x96xf32>
    %cst_54 = arith.constant dense<0.000000e+00> : vector<8x96xf32>
    %322 = tpu.matmul %298, %7, %cst_54 {dimension_numbers = #tpu.dot_dimension_numbers<[1], [0], [0], [1], [0, 0, 1, 1], [], []>} : vector<8x32xf32>, vector<32x96xf32>, vector<8x96xf32> -> vector<8x96xf32>
    %323 = vector.extract_strided_slice %321 {offsets = [0, 0], sizes = [8, 64], strides = [1, 1]} : vector<8x96xf32> to vector<8x64xf32>
    %324 = vector.extract_strided_slice %322 {offsets = [0, 0], sizes = [8, 64], strides = [1, 1]} : vector<8x96xf32> to vector<8x64xf32>
    %325 = arith.addf %323, %324 : vector<8x64xf32>
    %326 = arith.negf %325 : vector<8x64xf32>
    %327 = math.exp %326 : vector<8x64xf32>
    %cst_55 = arith.constant 1.000000e+00 : f32
    %328 = vector.broadcast %cst_55 : f32 to vector<8x64xf32>
    %329 = arith.addf %328, %327 : vector<8x64xf32>
    %330 = arith.divf %328, %329 : vector<8x64xf32>
    %331 = vector.extract_strided_slice %330 {offsets = [0, 0], sizes = [8, 32], strides = [1, 1]} : vector<8x64xf32> to vector<8x32xf32>
    %332 = vector.extract_strided_slice %330 {offsets = [0, 32], sizes = [8, 32], strides = [1, 1]} : vector<8x64xf32> to vector<8x32xf32>
    %333 = vector.extract_strided_slice %321 {offsets = [0, 64], sizes = [8, 32], strides = [1, 1]} : vector<8x96xf32> to vector<8x32xf32>
    %334 = vector.extract_strided_slice %322 {offsets = [0, 64], sizes = [8, 32], strides = [1, 1]} : vector<8x96xf32> to vector<8x32xf32>
    %335 = arith.addf %334, %11 : vector<8x32xf32>
    %336 = arith.mulf %331, %335 : vector<8x32xf32>
    %337 = arith.addf %333, %336 : vector<8x32xf32>
    %338 = math.tanh %337 : vector<8x32xf32>
    %339 = arith.subf %298, %338 : vector<8x32xf32>
    %340 = arith.mulf %332, %339 : vector<8x32xf32>
    %341 = arith.addf %338, %340 : vector<8x32xf32>
    %cst_56 = arith.constant dense<0.000000e+00> : vector<8x96xf32>
    %342 = tpu.matmul %319, %6, %cst_56 {dimension_numbers = #tpu.dot_dimension_numbers<[1], [0], [0], [1], [0, 0, 1, 1], [], []>} : vector<8x32xf32>, vector<32x96xf32>, vector<8x96xf32> -> vector<8x96xf32>
    %343 = arith.addf %342, %13 : vector<8x96xf32>
    %cst_57 = arith.constant dense<0.000000e+00> : vector<8x96xf32>
    %344 = tpu.matmul %341, %7, %cst_57 {dimension_numbers = #tpu.dot_dimension_numbers<[1], [0], [0], [1], [0, 0, 1, 1], [], []>} : vector<8x32xf32>, vector<32x96xf32>, vector<8x96xf32> -> vector<8x96xf32>
    %345 = vector.extract_strided_slice %343 {offsets = [0, 0], sizes = [8, 64], strides = [1, 1]} : vector<8x96xf32> to vector<8x64xf32>
    %346 = vector.extract_strided_slice %344 {offsets = [0, 0], sizes = [8, 64], strides = [1, 1]} : vector<8x96xf32> to vector<8x64xf32>
    %347 = arith.addf %345, %346 : vector<8x64xf32>
    %348 = arith.negf %347 : vector<8x64xf32>
    %349 = math.exp %348 : vector<8x64xf32>
    %cst_58 = arith.constant 1.000000e+00 : f32
    %350 = vector.broadcast %cst_58 : f32 to vector<8x64xf32>
    %351 = arith.addf %350, %349 : vector<8x64xf32>
    %352 = arith.divf %350, %351 : vector<8x64xf32>
    %353 = vector.extract_strided_slice %352 {offsets = [0, 0], sizes = [8, 32], strides = [1, 1]} : vector<8x64xf32> to vector<8x32xf32>
    %354 = vector.extract_strided_slice %352 {offsets = [0, 32], sizes = [8, 32], strides = [1, 1]} : vector<8x64xf32> to vector<8x32xf32>
    %355 = vector.extract_strided_slice %343 {offsets = [0, 64], sizes = [8, 32], strides = [1, 1]} : vector<8x96xf32> to vector<8x32xf32>
    %356 = vector.extract_strided_slice %344 {offsets = [0, 64], sizes = [8, 32], strides = [1, 1]} : vector<8x96xf32> to vector<8x32xf32>
    %357 = arith.addf %356, %11 : vector<8x32xf32>
    %358 = arith.mulf %353, %357 : vector<8x32xf32>
    %359 = arith.addf %355, %358 : vector<8x32xf32>
    %360 = math.tanh %359 : vector<8x32xf32>
    %361 = arith.subf %341, %360 : vector<8x32xf32>
    %362 = arith.mulf %354, %361 : vector<8x32xf32>
    %363 = arith.addf %360, %362 : vector<8x32xf32>
    %c0_59 = arith.constant 0 : index
    %c0_60 = arith.constant 0 : index
    %364 = vector.load %arg9[%c0_59, %c0_60] : memref<32x64xf32, #tpu.memory_space<vmem>>, vector<32x64xf32>
    %cst_61 = arith.constant dense<0.000000e+00> : vector<8x64xf32>
    %365 = tpu.matmul %363, %364, %cst_61 {dimension_numbers = #tpu.dot_dimension_numbers<[1], [0], [0], [1], [0, 0, 1, 1], [], []>} : vector<8x32xf32>, vector<32x64xf32>, vector<8x64xf32> -> vector<8x64xf32>
    %c0_62 = arith.constant 0 : index
    %c0_63 = arith.constant 0 : index
    %366 = vector.load %arg10[%c0_62, %c0_63] : memref<1x64xf32, #tpu.memory_space<vmem>>, vector<1x64xf32>
    %367 = vector.broadcast %366 : vector<1x64xf32> to vector<8x64xf32>
    %368 = arith.addf %365, %367 : vector<8x64xf32>
    %cst_64 = arith.constant 5.000000e-01 : f32
    %369 = vector.broadcast %cst_64 : f32 to vector<8x64xf32>
    %370 = arith.mulf %369, %368 : vector<8x64xf32>
    %cst_65 = arith.constant 0.707106769 : f32
    %371 = vector.broadcast %cst_65 : f32 to vector<8x64xf32>
    %372 = arith.mulf %368, %371 : vector<8x64xf32>
    %cst_66 = arith.constant 0.000000e+00 : f32
    %373 = vector.broadcast %cst_66 : f32 to vector<8x64xf32>
    %374 = arith.cmpf oge, %372, %373 : vector<8x64xf32>
    %cst_67 = arith.constant 1.000000e+00 : f32
    %cst_68 = arith.constant -1.000000e+00 : f32
    %375 = vector.broadcast %cst_67 : f32 to vector<8x64xf32>
    %376 = vector.broadcast %cst_68 : f32 to vector<8x64xf32>
    %377 = arith.select %374, %375, %376 : vector<8x64xi1>, vector<8x64xf32>
    %378 = math.absf %372 : vector<8x64xf32>
    %cst_69 = arith.constant 0.327591091 : f32
    %379 = vector.broadcast %cst_69 : f32 to vector<8x64xf32>
    %380 = arith.mulf %379, %378 : vector<8x64xf32>
    %cst_70 = arith.constant 1.000000e+00 : f32
    %381 = vector.broadcast %cst_70 : f32 to vector<8x64xf32>
    %382 = arith.addf %381, %380 : vector<8x64xf32>
    %cst_71 = arith.constant 1.000000e+00 : f32
    %383 = vector.broadcast %cst_71 : f32 to vector<8x64xf32>
    %384 = arith.divf %383, %382 : vector<8x64xf32>
    %cst_72 = arith.constant 1.06140542 : f32
    %385 = vector.broadcast %cst_72 : f32 to vector<8x64xf32>
    %386 = arith.mulf %385, %384 : vector<8x64xf32>
    %cst_73 = arith.constant -1.45315206 : f32
    %387 = vector.broadcast %cst_73 : f32 to vector<8x64xf32>
    %388 = arith.addf %386, %387 : vector<8x64xf32>
    %389 = arith.mulf %388, %384 : vector<8x64xf32>
    %cst_74 = arith.constant 1.42141378 : f32
    %390 = vector.broadcast %cst_74 : f32 to vector<8x64xf32>
    %391 = arith.addf %389, %390 : vector<8x64xf32>
    %392 = arith.mulf %391, %384 : vector<8x64xf32>
    %cst_75 = arith.constant -0.284496725 : f32
    %393 = vector.broadcast %cst_75 : f32 to vector<8x64xf32>
    %394 = arith.addf %392, %393 : vector<8x64xf32>
    %395 = arith.mulf %394, %384 : vector<8x64xf32>
    %cst_76 = arith.constant 0.254829586 : f32
    %396 = vector.broadcast %cst_76 : f32 to vector<8x64xf32>
    %397 = arith.addf %395, %396 : vector<8x64xf32>
    %398 = arith.mulf %397, %384 : vector<8x64xf32>
    %cst_77 = arith.constant 0.000000e+00 : f32
    %399 = vector.broadcast %cst_77 : f32 to vector<8x64xf32>
    %400 = arith.subf %399, %378 : vector<8x64xf32>
    %401 = arith.mulf %400, %378 : vector<8x64xf32>
    %402 = math.exp %401 : vector<8x64xf32>
    %403 = arith.mulf %398, %402 : vector<8x64xf32>
    %cst_78 = arith.constant 1.000000e+00 : f32
    %404 = vector.broadcast %cst_78 : f32 to vector<8x64xf32>
    %405 = arith.subf %404, %403 : vector<8x64xf32>
    %406 = arith.mulf %377, %405 : vector<8x64xf32>
    %cst_79 = arith.constant 1.000000e+00 : f32
    %407 = vector.broadcast %cst_79 : f32 to vector<8x64xf32>
    %408 = arith.addf %407, %406 : vector<8x64xf32>
    %409 = arith.mulf %370, %408 : vector<8x64xf32>
    %c0_80 = arith.constant 0 : index
    %c0_81 = arith.constant 0 : index
    %410 = vector.load %arg11[%c0_80, %c0_81] : memref<64x4xf32, #tpu.memory_space<vmem>>, vector<64x4xf32>
    %cst_82 = arith.constant dense<0.000000e+00> : vector<8x4xf32>
    %411 = tpu.matmul %409, %410, %cst_82 {dimension_numbers = #tpu.dot_dimension_numbers<[1], [0], [0], [1], [0, 0, 1, 1], [], []>} : vector<8x64xf32>, vector<64x4xf32>, vector<8x4xf32> -> vector<8x4xf32>
    %c0_83 = arith.constant 0 : index
    %c0_84 = arith.constant 0 : index
    %412 = vector.load %arg12[%c0_83, %c0_84] : memref<1x4xf32, #tpu.memory_space<vmem>>, vector<1x4xf32>
    %413 = vector.broadcast %412 : vector<1x4xf32> to vector<8x4xf32>
    %414 = arith.addf %411, %413 : vector<8x4xf32>
    %c0_85 = arith.constant 0 : index
    %c0_86 = arith.constant 0 : index
    %415 = vector.load %arg13[%c0_85, %c0_86] : memref<8x4xf32, #tpu.memory_space<vmem>>, vector<8x4xf32>
    tpu.vector_store %arg13[%c0_85, %c0_86], %414 {strides = array<i32>} : memref<8x4xf32, #tpu.memory_space<vmem>>, vector<8x4xf32>,
    return
  }
}

</mosaic_0001>

<bundles_post_ra>
// kernel: tpu_custom_call.1
= control target key start
LH: loop header
LB: loop body
LE: loop exit
PB: predicated region body
PF: predicated region fallthrough
CT: control target
= control target key end

     0   :  { %vm116_vm0 = vcmask 1043456   ;;  %vm91_vm1 = vcmask 31744   ;;  %v3452_v3 = vmov 0.0|0.0   ;;  %vm3453_vm2 = vmmov 0   ;;  %s3457_s25 = smov 32   ;;  %s4041_s1 = inlined_call_operand.vmem [shape: f32[4,96], index: 1, kind: input, shape index: {}]   ;;  %s4042_s0 = inlined_call_operand.vmem [shape: f32[64,4], index: 0, kind: input, shape index: {}]   ;;  %s4043_s2 = inlined_call_operand.vmem [shape: f32[32,96], index: 2, kind: input, shape index: {}]   ;;  %s4044_s4 = inlined_call_operand.vmem [shape: f32[1,32], index: 4, kind: input, shape index: {}]   ;;  %s4045_s3 = inlined_call_operand.vmem [shape: f32[1,96], index: 3, kind: input, shape index: {}]   ;;  %s4046_s5 = inlined_call_operand.vmem [shape: f32[32,96], index: 5, kind: input, shape index: {}]   ;;  %s4047_s8 = inlined_call_operand.vmem [shape: f32[1,32], index: 8, kind: input, shape index: {}]   ;;  %s4048_s6 = inlined_call_operand.vmem [shape: f32[32,96], index: 6, kind: input, shape index: {}]   ;;  %s4049_s7 = inlined_call_operand.vmem [shape: f32[1,96], index: 7, kind: input, shape index: {}]   ;;  %s4050_s9 = inlined_call_operand.vmem [shape: f32[32,64], index: 9, kind: input, shape index: {}]   ;;  %s4051_s11 = inlined_call_operand.vmem [shape: f32[64,4], index: 11, kind: input, shape index: {}]   ;;  %s4052_s10 = inlined_call_operand.vmem [shape: f32[1,64], index: 10, kind: input, shape index: {}]   ;;  %s4053_s12 = inlined_call_operand.vmem [shape: f32[1,4], index: 12, kind: input, shape index: {}]   ;;  %s4054_s13 = inlined_call_operand.vmem [shape: f32[8,4], index: 13, kind: output, shape index: {}]  }
   0x1   :  { %v44_v0 = vld [vmem:[%s4041_s1] sm:$0xf]  ;;  %v78_v2 = vld [vmem:[%s4042_s0 + $0x8] sm:$0xff]  ;;  %3189 = vmatprep.subr.bf16.mxu1 %v3452_v3  ;;  %v79_v6 = vld [vmem:[%s4042_s0 + $0x10] sm:$0xff]  ;;  %v3454_v8 = vmov 0.0   ;;  %vm225_vm3 = vcmask 261120  }
   0x2   :  { %v77_v1 = vld [vmem:[%s4042_s0] sm:$0xff]  ;;  %2875 = vmatprep.subr.msk.mxu0 %vm116_vm0, %v44_v0  ;;  %v46_v5 = vld [vmem:[%s4043_s2 + $0x8] sm:$0xff]  ;;  %2908 = vmatprep.mubr.msk.f32.mxu1 %vm3453_vm2, %v3454_v8  ;;  %v47_v9 = vld [vmem:[%s4043_s2 + $0x10] sm:$0xff]  ;;  %vm2598_vm5 = vcmask 523264  }
   0x3   :  { %2877 = vmatprep.mubr.msk.f32.mxu0 %vm91_vm1, %v77_v1  ;;  %v45_v4 = vld [vmem:[%s4043_s2] sm:$0xff]  ;;  %2876 = vmatpush3.msk.msra.mxu0 %vm116_vm0, %v44_v0  ;;  %v48_v10 = vld [vmem:[%s4043_s2 + $0x18] sm:$0xff]  ;;  %s3455_s2 = smov 64   ;;  %v82_v15 = vld [vmem:[%s4042_s0 + $0x28] sm:$0xff] }
   0x4   :  { %v3549_v7 = vpack.c.bf16 %v46_v5, %v45_v4  ;;  %2878 = vmatmul.mubr.msk.f32.vlgmr.msra.gmra.mrb[0].mxu0 %vm91_vm1, %v78_v2  ;;  %3183 = vmatprep.subr.bf16.mxu0 %v3452_v3  ;;  %v80_v11 = vld [vmem:[%s4042_s0 + $0x18] sm:$0xff]  ;;  %v3566_v12 = vpack.c.bf16 %v48_v10, %v47_v9  ;;  %v2677_v13 = vld [vmem:[%s4044_s4] ss:$0 sm:$0xff]  ;;  %v83_v16 = vld [vmem:[%s4042_s0 + $0x30] sm:$0xff] }
   0x5   :  { %2880 = vmatprep.mubr.msk.f32.mxu0 %vm91_vm1, %v79_v6  ;;  %v81_v14 = vld [vmem:[%s4042_s0 + $0x20] sm:$0xff]  ;;  %306 = vrot.lane.b32.xlu0 %v2677_v13, %s3455_s2  ;;  %v84_v17 = vld [vmem:[%s4042_s0 + $0x38] sm:$0xff]  ;;  %s3456_s0 = smov 96   ;;  %v57_v51 = vld [vmem:[%s4046_s5 + $0x8] sm:$0xff] }
   0x6   :  { %3185 = vmatpush3.bf16.msra.mxu0 %v3549_v7  ;;  %3191 = vmatpush3.bf16.msra.mxu1 %v3549_v7  ;;  %v2680_v18 = vld [vmem:[%s4045_s3] ss:$0 sm:$0xff]  ;;  %v58_v52 = vld [vmem:[%s4046_s5 + $0x10] sm:$0xff]  ;;  %v59_v54 = vld [vmem:[%s4046_s5 + $0x18] sm:$0xff] }
   0x7   :  { %3186 = vmatprep.subr.bf16.mxu0 %v3452_v3  ;;  %3192 = vmatprep.subr.bf16.mxu1 %v3452_v3  ;;  %v56_v50 = vld [vmem:[%s4046_s5] sm:$0xff]  ;;  %v3639_v55 = vpack.c.bf16 %v59_v54, %v58_v52  ;;  %v61_v62 = vld [vmem:[%s4048_s6 + $0x8] sm:$0xff]  ;;  %v62_v0 = vld [vmem:[%s4048_s6 + $0x10] sm:$0xff] }
   0x8   :  { %2881 = vmatmul.mubr.msk.f32.gmra.mrb[2].mxu0 %vm91_vm1, %v80_v11  ;;  %v3633_v53 = vpack.c.bf16 %v57_v51, %v56_v50  ;;  %v2678_v58 = vld [vmem:[%s4047_s8] ss:$0 sm:$0xff]  ;;  %v63_v1 = vld [vmem:[%s4048_s6 + $0x18] sm:$0xff] }
   0x9   :  { %2883 = vmatprep.mubr.msk.f32.mxu0 %vm91_vm1, %v81_v14  ;;  %v60_v61 = vld [vmem:[%s4048_s6] sm:$0xff]  ;;  %v3670_v4 = vpack.c.bf16 %v63_v1, %v62_v0 }
   0xa   :  { %3188 = vmatpush3.bf16.msra.mxu0 %v3566_v12  ;;  %3194 = vmatpush3.bf16.msra.mxu1 %v3566_v12  ;;  %v3659_v63 = vpack.c.bf16 %v61_v62, %v60_v61 }
   0xb   :  { %3195 = vmatprep.subr.bf16.mxu0 %v3452_v3  ;;  %3201 = vmatprep.subr.bf16.mxu1 %v3452_v3 }
   0xc   :  { %2884 = vmatmul.mubr.msk.f32.gmra.mrb[4].mxu0 %vm91_vm1, %v82_v15 }
   0xd   :  { %2886 = vmatprep.mubr.msk.f32.mxu0 %vm91_vm1, %v83_v16 }
  0x10   :  { %2887 = vmatmul.mubr.msk.f32.gmra.mrb[6].mxu0 %vm91_vm1, %v84_v17 }
  0x11   :  { %2897 = vmatprep.mubr.msk.f32.mxu0 %vm3453_vm2, %v3454_v8 }
  0x14   :  { %2898 = vmatmul.mubr.f32.vlgmr.msra.gmra.mrb[8].mxu0 %v3454_v8 }
  0x15   :  { %2919 = vmatprep.mubr.msk.f32.mxu0 %vm3453_vm2, %v3454_v8  ;;  %3197 = vmatpush3.bf16.msra.mxu0 %v3633_v53 }
  0x16   :  { %3198 = vmatprep.subr.bf16.mxu0 %v3452_v3 }
  0x19   :  { %3200 = vmatpush3.bf16.msra.mxu0 %v3639_v55 }
  0x1a   :  { %3207 = vmatprep.subr.bf16.mxu0 %v3452_v3 }
  0x77   :  { %v3618_v34 = vpop.permute.xlu0 %306 }
  0xd7   :  { %v2879_v19 = vpop.f32.mrb[0].mxu0 }
  0xd8   :  { %v3604_v20 = vadd.f32 %v2879_v19, %v2680_v18  ;;  %v186_v21 = vpop.f32.mrb[1].mxu0 }
  0xd9   :  { %v187_v38 = vadd.f32 %v2680_v18, %v186_v21 }
  0xdb   :  { %v2882_v22 = vpop.f32.mrb[2].mxu0 }
  0xdc   :  { %v3606_v23 = vadd.f32 %v2882_v22, %v2680_v18  ;;  %v196_v24 = vpop.f32.mrb[3].mxu0 }
  0xdd   :  { %v3608_v25 = vadd.f32 %v2680_v18, %v196_v24 }
  0xdf   :  { %v2885_v26 = vpop.f32.mrb[4].mxu0 }
  0xe0   :  { %v3610_v27 = vadd.f32 %v2885_v26, %v2680_v18  ;;  %v206_v28 = vpop.f32.mrb[5].mxu0 }
  0xe1   :  { %v3612_v29 = vadd.f32 %v2680_v18, %v206_v28 }
  0xe3   :  { %v2888_v30 = vpop.f32.mrb[6].mxu0 }
  0xe4   :  { %v3614_v31 = vadd.f32 %v2888_v30, %v2680_v18  ;;  %v216_v32 = vpop.f32.mrb[7].mxu0 }
  0xe5   :  { %v3616_v33 = vadd.f32 %v2680_v18, %v216_v32  ;;  %v3700_v18 = vld [vmem:[%s4049_s7] ss:$0 sm:$0xff] }
  0xe7   :  { %v295_v35 = vpop.f32.mrb[8].mxu0 }
  0xe8   :  { %v309_v36 = vadd.f32 %v3618_v34, %v295_v35  ;;  %v2899_v37 = vpop.f32.mrb[9].mxu0  ;;  %v299_v39 = vadd.f32 %v295_v35, %v187_v38 }
  0xea   :  { %311 = vrot.lane.b32.xlu0 %v309_v36, %s3455_s2  ;;  %v2690_v40 = vmul.f32 -1.442695, %v299_v39 }
  0xec   :  { %3352 = vpow2.f32 %v2690_v40 }
  0xf6   :  { %v3353_v41 = vpop.eup %3352 }
  0xf7   :  { %v303_v42 = vadd.f32 1.0, %v3353_v41 }
  0xf9   :  { %3354 = vrcp.f32 %v303_v42 }
 0x103   :  { %v3355_v43 = vpop.eup %3354 }
 0x15c   :  { %v312_v44 = vpop.permute.xlu0 %311 }
 0x15d   :  { %v314_v45 = vmul.f32 %v3355_v43, %v312_v44 }
 0x15f   :  { %316 = vrot.lane.b32.xlu1 %v314_v45, %s3455_s2 }
 0x1d1   :  { %v317_v46 = vpop.permute.xlu1 %316 }
 0x1d2   :  { %v319_v47 = vadd.f32 %v317_v46, %v187_v38 }
 0x1d4   :  { %3356 = vtanh.f32 %v319_v47 }
 0x1de   :  { %v3357_v48 = vpop.eup %3356 }
 0x1df   :  { %v321_v49 = vsub.f32 0.0, %v3357_v48 }
 0x1e1   :  { %323 = vrot.lane.b32.xlu1 %v321_v49, %s3456_s0 }
 0x253   :  { %v324_v56 = vpop.permute.xlu1 %323 }
 0x254   :  { %v326_v57 = vmul.f32 %v3355_v43, %v324_v56 }
 0x256   :  { %328 = vrot.lane.b32.xlu0 %v326_v57, %s3457_s25 }
 0x25a   :  { %584 = vrot.lane.b32.xlu0 %v2678_v58, %s3455_s2 }
 0x2c8   :  { %v329_v59 = vpop.permute.xlu0 %328 }
 0x2c9   :  { %v3649_v60 = vadd.f32 %v3357_v48, %v329_v59 }
 0x2cb   :  { %333 = vrot.lane.b32.xlu1 %v3649_v60, %s3455_s2 }
 0x2cc   :  { %v3692_v13 = vpop.permute.xlu0 %584 }
 0x33d   :  { %v334_v2 = vpop.permute.xlu1 %333 }
 0x33e   :  { %2909 = vmatmul.mubr.msk.f32.vlgmr.msra.gmra.mrb[0].mxu1 %vm225_vm3, %v334_v2  ;;  %2920 = vmatmul.mubr.msk.f32.vlgmr.msra.gmra.mrb[10].mxu0 %vm225_vm3, %v334_v2 }
 0x33f   :  { %3203 = vmatpush3.bf16.msra.mxu1 %v3659_v63  ;;  %2930 = vmatprep.mubr.msk.f32.mxu1 %vm3453_vm2, %v3454_v8 }
 0x340   :  { %3204 = vmatprep.subr.bf16.mxu1 %v3452_v3  ;;  %3209 = vmatpush3.bf16.msra.mxu0 %v3549_v7 }
 0x341   :  { %3210 = vmatprep.subr.bf16.mxu0 %v3452_v3  ;;  %2941 = vmatprep.mubr.msk.f32.mxu0 %vm3453_vm2, %v3454_v8 }
 0x343   :  { %3206 = vmatpush3.bf16.msra.mxu1 %v3670_v4 }
 0x344   :  { %3213 = vmatprep.subr.bf16.mxu1 %v3452_v3  ;;  %3212 = vmatpush3.bf16.msra.mxu0 %v3566_v12 }
 0x345   :  { %3219 = vmatprep.subr.bf16.mxu0 %v3452_v3 }
 0x346   :  { %2931 = vmatmul.mubr.f32.vlgmr.msra.gmra.mrb[2].mxu1 %v3454_v8 }
 0x347   :  { %3215 = vmatpush3.bf16.msra.mxu1 %v3633_v53  ;;  %2952 = vmatprep.mubr.msk.f32.mxu1 %vm3453_vm2, %v3454_v8 }
 0x348   :  { %3216 = vmatprep.subr.bf16.mxu1 %v3452_v3 }
 0x34b   :  { %3218 = vmatpush3.bf16.msra.mxu1 %v3639_v55 }
 0x34c   :  { %3225 = vmatprep.subr.bf16.mxu1 %v3452_v3 }
 0x411   :  { %v403_v5 = vpop.f32.mrb[0].mxu1  ;;  %v503_v6 = vpop.f32.mrb[10].mxu0 }
 0x412   :  { %v414_v9 = vadd.f32 %v403_v5, %v3618_v34  ;;  %v2910_v10 = vpop.f32.mrb[1].mxu1  ;;  %v2921_v11 = vpop.f32.mrb[11].mxu0  ;;  %v407_v17 = vadd.f32 %v403_v5, %v3604_v20  ;;  %v504_v21 = vadd.f32 %v3700_v18, %v503_v6 }
 0x414   :  { %416 = vrot.lane.b32.xlu1 %v414_v9, %s3455_s2  ;;  %v2692_v19 = vmul.f32 -1.442695, %v407_v17 }
 0x416   :  { %3358 = vpow2.f32 %v2692_v19 }
 0x419   :  { %v573_v14 = vpop.f32.mrb[2].mxu1 }
 0x41a   :  { %v2932_v15 = vpop.f32.mrb[3].mxu1  ;;  %v587_v16 = vadd.f32 %v3692_v13, %v573_v14  ;;  %v577_v22 = vadd.f32 %v573_v14, %v504_v21 }
 0x41c   :  { %589 = vrot.lane.b32.xlu0 %v587_v16, %s3455_s2  ;;  %v2694_v24 = vmul.f32 -1.442695, %v577_v22 }
 0x41e   :  { %3360 = vpow2.f32 %v2694_v24 }
 0x420   :  { %v3359_v26 = vpop.eup %3358 }
 0x421   :  { %v411_v28 = vadd.f32 1.0, %v3359_v26 }
 0x423   :  { %3362 = vrcp.f32 %v411_v28 }
 0x428   :  { %v3361_v30 = vpop.eup %3360 }
 0x429   :  { %v581_v32 = vadd.f32 1.0, %v3361_v30 }
 0x42b   :  { %3364 = vrcp.f32 %v581_v32 }
 0x42d   :  { %v3363_v35 = vpop.eup %3362 }
 0x435   :  { %v3365_v38 = vpop.eup %3364 }
 0x486   :  { %v417_v36 = vpop.permute.xlu1 %416 }
 0x487   :  { %v419_v37 = vmul.f32 %v3363_v35, %v417_v36 }
 0x489   :  { %421 = vrot.lane.b32.xlu1 %v419_v37, %s3455_s2 }
 0x48e   :  { %v590_v39 = vpop.permute.xlu0 %589 }
 0x48f   :  { %v592_v40 = vmul.f32 %v3365_v38, %v590_v39 }
 0x491   :  { %594 = vrot.lane.b32.xlu0 %v592_v40, %s3455_s2 }
 0x4fb   :  { %v422_v41 = vpop.permute.xlu1 %421 }
 0x4fc   :  { %v424_v42 = vadd.f32 %v422_v41, %v3604_v20 }
 0x4fe   :  { %3366 = vtanh.f32 %v424_v42 }
 0x503   :  { %v595_v43 = vpop.permute.xlu0 %594 }
 0x504   :  { %v597_v44 = vadd.f32 %v595_v43, %v504_v21 }
 0x506   :  { %3368 = vtanh.f32 %v597_v44 }
 0x508   :  { %v3367_v45 = vpop.eup %3366 }
 0x509   :  { %v426_v46 = vsub.f32 %v3649_v60, %v3367_v45 }
 0x50b   :  { %428 = vrot.lane.b32.xlu1 %v426_v46, %s3456_s0 }
 0x510   :  { %v3369_v47 = vpop.eup %3368 }
 0x511   :  { %v599_v48 = vsub.f32 0.0, %v3369_v47 }
 0x513   :  { %601 = vrot.lane.b32.xlu0 %v599_v48, %s3456_s0 }
 0x57d   :  { %v429_v49 = vpop.permute.xlu1 %428 }
 0x57e   :  { %v431_v50 = vmul.f32 %v3363_v35, %v429_v49 }
 0x580   :  { %433 = vrot.lane.b32.xlu1 %v431_v50, %s3457_s25 }
 0x585   :  { %v602_v51 = vpop.permute.xlu0 %601 }
 0x586   :  { %v604_v52 = vmul.f32 %v3365_v38, %v602_v51 }
 0x588   :  { %606 = vrot.lane.b32.xlu0 %v604_v52, %s3457_s25 }
 0x5f2   :  { %v434_v20 = vpop.permute.xlu1 %433 }
 0x5f3   :  { %v3711_v54 = vadd.f32 %v3367_v45, %v434_v20 }
 0x5f5   :  { %611 = vrot.lane.b32.xlu1 %v3711_v54, %s3455_s2 }
 0x5fa   :  { %v607_v56 = vpop.permute.xlu0 %606 }
 0x5fb   :  { %v3715_v57 = vadd.f32 %v3369_v47, %v607_v56 }
 0x5fd   :  { %786 = vrot.lane.b32.xlu0 %v3715_v57, %s3455_s2 }
 0x667   :  { %v612_v58 = vpop.permute.xlu1 %611 }
 0x668   :  { %2942 = vmatmul.mubr.msk.f32.vlgmr.msra.gmra.mrb[12].mxu0 %vm225_vm3, %v612_v58  ;;  %2953 = vmatmul.mubr.msk.f32.vlgmr.msra.gmra.mrb[4].mxu1 %vm225_vm3, %v612_v58 }
 0x669   :  { %3221 = vmatpush3.bf16.msra.mxu0 %v3659_v63  ;;  %2963 = vmatprep.mubr.msk.f32.mxu0 %vm3453_vm2, %v3454_v8 }
 0x66a   :  { %3222 = vmatprep.subr.bf16.mxu0 %v3452_v3  ;;  %3227 = vmatpush3.bf16.msra.mxu1 %v3549_v7 }
 0x66b   :  { %3228 = vmatprep.subr.bf16.mxu1 %v3452_v3  ;;  %2974 = vmatprep.mubr.msk.f32.mxu1 %vm3453_vm2, %v3454_v8 }
 0x66d   :  { %3224 = vmatpush3.bf16.msra.mxu0 %v3670_v4 }
 0x66e   :  { %3231 = vmatprep.subr.bf16.mxu0 %v3452_v3  ;;  %3230 = vmatpush3.bf16.msra.mxu1 %v3566_v12 }
 0x66f   :  { %v787_v59 = vpop.permute.xlu0 %786  ;;  %3237 = vmatprep.subr.bf16.mxu1 %v3452_v3 }
 0x670   :  { %2964 = vmatmul.mubr.msk.f32.vlgmr.msra.gmra.mrb[14].mxu0 %vm225_vm3, %v787_v59 }
 0x671   :  { %3233 = vmatpush3.bf16.msra.mxu0 %v3633_v53  ;;  %2985 = vmatprep.mubr.msk.f32.mxu0 %vm3453_vm2, %v3454_v8 }
 0x672   :  { %3234 = vmatprep.subr.bf16.mxu0 %v3452_v3 }
 0x675   :  { %3236 = vmatpush3.bf16.msra.mxu0 %v3639_v55 }
 0x676   :  { %3243 = vmatprep.subr.bf16.mxu0 %v3452_v3 }
 0x73b   :  { %v681_v60 = vpop.f32.mrb[12].mxu0  ;;  %v781_v61 = vpop.f32.mrb[4].mxu1 }
 0x73c   :  { %v692_v62 = vadd.f32 %v681_v60, %v3618_v34  ;;  %v2943_v0 = vpop.f32.mrb[13].mxu0  ;;  %v2954_v1 = vpop.f32.mrb[5].mxu1  ;;  %v685_v9 = vadd.f32 %v681_v60, %v3608_v25  ;;  %v782_v11 = vadd.f32 %v3700_v18, %v781_v61 }
 0x73e   :  { %694 = vrot.lane.b32.xlu1 %v692_v62, %s3455_s2  ;;  %v2696_v10 = vmul.f32 -1.442695, %v685_v9 }
 0x740   :  { %3370 = vpow2.f32 %v2696_v10 }
 0x743   :  { %v856_v2 = vpop.f32.mrb[14].mxu0 }
 0x744   :  { %v867_v5 = vadd.f32 %v856_v2, %v3692_v13  ;;  %v2965_v6 = vpop.f32.mrb[15].mxu0  ;;  %v860_v14 = vadd.f32 %v856_v2, %v782_v11 }
 0x746   :  { %869 = vrot.lane.b32.xlu0 %v867_v5, %s3455_s2  ;;  %v2699_v15 = vmul.f32 -1.442695, %v860_v14 }
 0x748   :  { %3372 = vpow2.f32 %v2699_v15 }
 0x74a   :  { %v3371_v16 = vpop.eup %3370 }
 0x74b   :  { %v689_v17 = vadd.f32 1.0, %v3371_v16 }
 0x74d   :  { %3374 = vrcp.f32 %v689_v17 }
 0x752   :  { %v3373_v19 = vpop.eup %3372 }
 0x753   :  { %v864_v21 = vadd.f32 1.0, %v3373_v19 }
 0x755   :  { %3376 = vrcp.f32 %v864_v21 }
 0x757   :  { %v3375_v22 = vpop.eup %3374 }
 0x75f   :  { %v3377_v28 = vpop.eup %3376 }
 0x7b0   :  { %v695_v24 = vpop.permute.xlu1 %694 }
 0x7b1   :  { %v697_v26 = vmul.f32 %v3375_v22, %v695_v24 }
 0x7b3   :  { %699 = vrot.lane.b32.xlu1 %v697_v26, %s3455_s2 }
 0x7b8   :  { %v870_v30 = vpop.permute.xlu0 %869 }
 0x7b9   :  { %v872_v32 = vmul.f32 %v3377_v28, %v870_v30 }
 0x7bb   :  { %874 = vrot.lane.b32.xlu0 %v872_v32, %s3455_s2 }
 0x825   :  { %v700_v35 = vpop.permute.xlu1 %699 }
 0x826   :  { %v702_v36 = vadd.f32 %v700_v35, %v3608_v25 }
 0x828   :  { %3378 = vtanh.f32 %v702_v36 }
 0x82d   :  { %v875_v37 = vpop.permute.xlu0 %874 }
 0x82e   :  { %v877_v38 = vadd.f32 %v875_v37, %v782_v11 }
 0x830   :  { %3380 = vtanh.f32 %v877_v38 }
 0x832   :  { %v3379_v39 = vpop.eup %3378 }
 0x833   :  { %v704_v40 = vsub.f32 %v3711_v54, %v3379_v39 }
 0x835   :  { %706 = vrot.lane.b32.xlu1 %v704_v40, %s3456_s0 }
 0x83a   :  { %v3381_v41 = vpop.eup %3380 }
 0x83b   :  { %v879_v42 = vsub.f32 %v3715_v57, %v3381_v41 }
 0x83d   :  { %881 = vrot.lane.b32.xlu0 %v879_v42, %s3456_s0 }
 0x8a7   :  { %v707_v43 = vpop.permute.xlu1 %706 }
 0x8a8   :  { %v709_v44 = vmul.f32 %v3375_v22, %v707_v43 }
 0x8aa   :  { %711 = vrot.lane.b32.xlu1 %v709_v44, %s3457_s25 }
 0x8af   :  { %v882_v45 = vpop.permute.xlu0 %881 }
 0x8b0   :  { %v884_v25 = vmul.f32 %v3377_v28, %v882_v45 }
 0x8b2   :  { %886 = vrot.lane.b32.xlu0 %v884_v25, %s3457_s25 }
 0x91c   :  { %v712_v46 = vpop.permute.xlu1 %711 }
 0x91d   :  { %v3755_v47 = vadd.f32 %v3379_v39, %v712_v46 }
 0x91f   :  { %891 = vrot.lane.b32.xlu1 %v3755_v47, %s3455_s2 }
 0x924   :  { %v887_v48 = vpop.permute.xlu0 %886 }
 0x925   :  { %v3759_v49 = vadd.f32 %v3381_v41, %v887_v48 }
 0x927   :  { %1066 = vrot.lane.b32.xlu0 %v3759_v49, %s3455_s2 }
 0x991   :  { %v892_v50 = vpop.permute.xlu1 %891 }
 0x992   :  { %2975 = vmatmul.mubr.msk.f32.vlgmr.msra.gmra.mrb[6].mxu1 %vm225_vm3, %v892_v50  ;;  %2986 = vmatmul.mubr.msk.f32.vlgmr.msra.gmra.mrb[16].mxu0 %vm225_vm3, %v892_v50 }
 0x993   :  { %3239 = vmatpush3.bf16.msra.mxu1 %v3659_v63  ;;  %2996 = vmatprep.mubr.msk.f32.mxu1 %vm3453_vm2, %v3454_v8 }
 0x994   :  { %3240 = vmatprep.subr.bf16.mxu1 %v3452_v3  ;;  %3245 = vmatpush3.bf16.msra.mxu0 %v3549_v7 }
 0x995   :  { %3246 = vmatprep.subr.bf16.mxu0 %v3452_v3  ;;  %3007 = vmatprep.mubr.msk.f32.mxu0 %vm3453_vm2, %v3454_v8 }
 0x997   :  { %3242 = vmatpush3.bf16.msra.mxu1 %v3670_v4 }
 0x998   :  { %3249 = vmatprep.subr.bf16.mxu1 %v3452_v3  ;;  %3248 = vmatpush3.bf16.msra.mxu0 %v3566_v12 }
 0x999   :  { %v1067_v51 = vpop.permute.xlu0 %1066  ;;  %3255 = vmatprep.subr.bf16.mxu0 %v3452_v3 }
 0x99a   :  { %2997 = vmatmul.mubr.msk.f32.vlgmr.msra.gmra.mrb[8].mxu1 %vm225_vm3, %v1067_v51 }
 0x99b   :  { %3251 = vmatpush3.bf16.msra.mxu1 %v3633_v53  ;;  %3018 = vmatprep.mubr.msk.f32.mxu1 %vm3453_vm2, %v3454_v8 }
 0x99c   :  { %3252 = vmatprep.subr.bf16.mxu1 %v3452_v3 }
 0x99f   :  { %3254 = vmatpush3.bf16.msra.mxu1 %v3639_v55 }
 0x9a0   :  { %3261 = vmatprep.subr.bf16.mxu1 %v3452_v3 }
 0xa65   :  { %v961_v52 = vpop.f32.mrb[6].mxu1  ;;  %v1061_v20 = vpop.f32.mrb[16].mxu0 }
 0xa66   :  { %v972_v54 = vadd.f32 %v961_v52, %v3618_v34  ;;  %v2976_v56 = vpop.f32.mrb[7].mxu1  ;;  %v2987_v57 = vpop.f32.mrb[17].mxu0  ;;  %v965_v61 = vadd.f32 %v961_v52, %v3606_v23  ;;  %v1062_v0 = vadd.f32 %v3700_v18, %v1061_v20 }
 0xa68   :  { %974 = vrot.lane.b32.xlu1 %v972_v54, %s3455_s2  ;;  %v2701_v62 = vmul.f32 -1.442695, %v965_v61 }
 0xa6a   :  { %3382 = vpow2.f32 %v2701_v62 }
 0xa6d   :  { %v1136_v58 = vpop.f32.mrb[8].mxu1 }
 0xa6e   :  { %v1147_v59 = vadd.f32 %v1136_v58, %v3692_v13  ;;  %v2998_v60 = vpop.f32.mrb[9].mxu1  ;;  %v1140_v1 = vadd.f32 %v1136_v58, %v1062_v0 }
 0xa70   :  { %1149 = vrot.lane.b32.xlu0 %v1147_v59, %s3455_s2  ;;  %v2704_v2 = vmul.f32 -1.442695, %v1140_v1 }
 0xa72   :  { %3384 = vpow2.f32 %v2704_v2 }
 0xa74   :  { %v3383_v5 = vpop.eup %3382 }
 0xa75   :  { %v969_v6 = vadd.f32 1.0, %v3383_v5 }
 0xa77   :  { %3386 = vrcp.f32 %v969_v6 }
 0xa7c   :  { %v3385_v9 = vpop.eup %3384 }
 0xa7d   :  { %v1144_v10 = vadd.f32 1.0, %v3385_v9 }
 0xa7f   :  { %3388 = vrcp.f32 %v1144_v10 }
 0xa81   :  { %v3387_v11 = vpop.eup %3386 }
 0xa89   :  { %v3389_v16 = vpop.eup %3388 }
 0xada   :  { %v975_v14 = vpop.permute.xlu1 %974 }
 0xadb   :  { %v977_v15 = vmul.f32 %v3387_v11, %v975_v14 }
 0xadd   :  { %979 = vrot.lane.b32.xlu1 %v977_v15, %s3455_s2 }
 0xae2   :  { %v1150_v17 = vpop.permute.xlu0 %1149 }
 0xae3   :  { %v1152_v19 = vmul.f32 %v3389_v16, %v1150_v17 }
 0xae5   :  { %1154 = vrot.lane.b32.xlu0 %v1152_v19, %s3455_s2 }
 0xb4f   :  { %v980_v21 = vpop.permute.xlu1 %979 }
 0xb50   :  { %v982_v22 = vadd.f32 %v980_v21, %v3606_v23 }
 0xb52   :  { %3390 = vtanh.f32 %v982_v22 }
 0xb57   :  { %v1155_v24 = vpop.permute.xlu0 %1154 }
 0xb58   :  { %v1157_v26 = vadd.f32 %v1155_v24, %v1062_v0 }
 0xb5a   :  { %3392 = vtanh.f32 %v1157_v26 }
 0xb5c   :  { %v3391_v28 = vpop.eup %3390 }
 0xb5d   :  { %v984_v30 = vsub.f32 %v3755_v47, %v3391_v28 }
 0xb5f   :  { %986 = vrot.lane.b32.xlu1 %v984_v30, %s3456_s0 }
 0xb64   :  { %v3393_v32 = vpop.eup %3392 }
 0xb65   :  { %v1159_v35 = vsub.f32 %v3759_v49, %v3393_v32 }
 0xb67   :  { %1161 = vrot.lane.b32.xlu0 %v1159_v35, %s3456_s0 }
 0xbd1   :  { %v987_v36 = vpop.permute.xlu1 %986 }
 0xbd2   :  { %v989_v37 = vmul.f32 %v3387_v11, %v987_v36 }
 0xbd4   :  { %991 = vrot.lane.b32.xlu1 %v989_v37, %s3457_s25 }
 0xbd9   :  { %v1162_v38 = vpop.permute.xlu0 %1161 }
 0xbda   :  { %v1164_v23 = vmul.f32 %v3389_v16, %v1162_v38 }
 0xbdc   :  { %1166 = vrot.lane.b32.xlu0 %v1164_v23, %s3457_s25 }
 0xc46   :  { %v992_v39 = vpop.permute.xlu1 %991 }
 0xc47   :  { %v3799_v40 = vadd.f32 %v3391_v28, %v992_v39 }
 0xc49   :  { %1171 = vrot.lane.b32.xlu1 %v3799_v40, %s3455_s2 }
 0xc4e   :  { %v1167_v41 = vpop.permute.xlu0 %1166 }
 0xc4f   :  { %v3803_v42 = vadd.f32 %v3393_v32, %v1167_v41 }
 0xc51   :  { %1346 = vrot.lane.b32.xlu0 %v3803_v42, %s3455_s2 }
 0xcbb   :  { %v1172_v43 = vpop.permute.xlu1 %1171 }
 0xcbc   :  { %3008 = vmatmul.mubr.msk.f32.vlgmr.msra.gmra.mrb[18].mxu0 %vm225_vm3, %v1172_v43  ;;  %3019 = vmatmul.mubr.msk.f32.vlgmr.msra.gmra.mrb[10].mxu1 %vm225_vm3, %v1172_v43 }
 0xcbd   :  { %3257 = vmatpush3.bf16.msra.mxu0 %v3659_v63  ;;  %3029 = vmatprep.mubr.msk.f32.mxu0 %vm3453_vm2, %v3454_v8 }
 0xcbe   :  { %3258 = vmatprep.subr.bf16.mxu0 %v3452_v3  ;;  %3263 = vmatpush3.bf16.msra.mxu1 %v3549_v7 }
 0xcbf   :  { %3264 = vmatprep.subr.bf16.mxu1 %v3452_v3  ;;  %3040 = vmatprep.mubr.msk.f32.mxu1 %vm3453_vm2, %v3454_v8 }
 0xcc1   :  { %3260 = vmatpush3.bf16.msra.mxu0 %v3670_v4 }
 0xcc2   :  { %3267 = vmatprep.subr.bf16.mxu0 %v3452_v3  ;;  %3266 = vmatpush3.bf16.msra.mxu1 %v3566_v12 }
 0xcc3   :  { %v1347_v44 = vpop.permute.xlu0 %1346  ;;  %3273 = vmatprep.subr.bf16.mxu1 %v3452_v3 }
 0xcc4   :  { %3030 = vmatmul.mubr.msk.f32.vlgmr.msra.gmra.mrb[20].mxu0 %vm225_vm3, %v1347_v44 }
 0xcc5   :  { %3269 = vmatpush3.bf16.msra.mxu0 %v3633_v53  ;;  %3051 = vmatprep.mubr.msk.f32.mxu0 %vm3453_vm2, %v3454_v8 }
 0xcc6   :  { %3270 = vmatprep.subr.bf16.mxu0 %v3452_v3 }
 0xcc9   :  { %3272 = vmatpush3.bf16.msra.mxu0 %v3639_v55 }
 0xcca   :  { %3279 = vmatprep.subr.bf16.mxu0 %v3452_v3 }
 0xd8f   :  { %v1241_v45 = vpop.f32.mrb[18].mxu0  ;;  %v1341_v25 = vpop.f32.mrb[10].mxu1 }
 0xd90   :  { %v1252_v46 = vadd.f32 %v1241_v45, %v3618_v34  ;;  %v3009_v47 = vpop.f32.mrb[19].mxu0  ;;  %v3020_v48 = vpop.f32.mrb[11].mxu1  ;;  %v1245_v52 = vadd.f32 %v1241_v45, %v3612_v29  ;;  %v1342_v54 = vadd.f32 %v3700_v18, %v1341_v25 }
 0xd92   :  { %1254 = vrot.lane.b32.xlu1 %v1252_v46, %s3455_s2  ;;  %v2706_v20 = vmul.f32 -1.442695, %v1245_v52 }
 0xd94   :  { %3394 = vpow2.f32 %v2706_v20 }
 0xd97   :  { %v1416_v49 = vpop.f32.mrb[20].mxu0 }
 0xd98   :  { %v1427_v50 = vadd.f32 %v1416_v49, %v3692_v13  ;;  %v3031_v51 = vpop.f32.mrb[21].mxu0  ;;  %v1420_v56 = vadd.f32 %v1416_v49, %v1342_v54 }
 0xd9a   :  { %1429 = vrot.lane.b32.xlu0 %v1427_v50, %s3455_s2  ;;  %v2709_v57 = vmul.f32 -1.442695, %v1420_v56 }
 0xd9c   :  { %3396 = vpow2.f32 %v2709_v57 }
 0xd9e   :  { %v3395_v58 = vpop.eup %3394 }
 0xd9f   :  { %v1249_v59 = vadd.f32 1.0, %v3395_v58 }
 0xda1   :  { %3398 = vrcp.f32 %v1249_v59 }
 0xda6   :  { %v3397_v60 = vpop.eup %3396 }
 0xda7   :  { %v1424_v61 = vadd.f32 1.0, %v3397_v60 }
 0xda9   :  { %3400 = vrcp.f32 %v1424_v61 }
 0xdab   :  { %v3399_v62 = vpop.eup %3398 }
 0xdb3   :  { %v3401_v2 = vpop.eup %3400 }
 0xe04   :  { %v1255_v0 = vpop.permute.xlu1 %1254 }
 0xe05   :  { %v1257_v1 = vmul.f32 %v3399_v62, %v1255_v0 }
 0xe07   :  { %1259 = vrot.lane.b32.xlu1 %v1257_v1, %s3455_s2 }
 0xe0c   :  { %v1430_v5 = vpop.permute.xlu0 %1429 }
 0xe0d   :  { %v1432_v6 = vmul.f32 %v3401_v2, %v1430_v5 }
 0xe0f   :  { %1434 = vrot.lane.b32.xlu0 %v1432_v6, %s3455_s2 }
 0xe79   :  { %v1260_v9 = vpop.permute.xlu1 %1259 }
 0xe7a   :  { %v1262_v10 = vadd.f32 %v1260_v9, %v3612_v29 }
 0xe7c   :  { %3402 = vtanh.f32 %v1262_v10 }
 0xe81   :  { %v1435_v11 = vpop.permute.xlu0 %1434 }
 0xe82   :  { %v1437_v14 = vadd.f32 %v1435_v11, %v1342_v54 }
 0xe84   :  { %3404 = vtanh.f32 %v1437_v14 }
 0xe86   :  { %v3403_v15 = vpop.eup %3402 }
 0xe87   :  { %v1264_v16 = vsub.f32 %v3799_v40, %v3403_v15 }
 0xe89   :  { %1266 = vrot.lane.b32.xlu1 %v1264_v16, %s3456_s0 }
 0xe8e   :  { %v3405_v17 = vpop.eup %3404 }
 0xe8f   :  { %v1439_v19 = vsub.f32 %v3803_v42, %v3405_v17 }
 0xe91   :  { %1441 = vrot.lane.b32.xlu0 %v1439_v19, %s3456_s0 }
 0xefb   :  { %v1267_v21 = vpop.permute.xlu1 %1266 }
 0xefc   :  { %v1269_v22 = vmul.f32 %v3399_v62, %v1267_v21 }
 0xefe   :  { %1271 = vrot.lane.b32.xlu1 %v1269_v22, %s3457_s25 }
 0xf03   :  { %v1442_v24 = vpop.permute.xlu0 %1441 }
 0xf04   :  { %v1444_v29 = vmul.f32 %v3401_v2, %v1442_v24 }
 0xf06   :  { %1446 = vrot.lane.b32.xlu0 %v1444_v29, %s3457_s25 }
 0xf70   :  { %v1272_v26 = vpop.permute.xlu1 %1271 }
 0xf71   :  { %v3843_v28 = vadd.f32 %v3403_v15, %v1272_v26 }
 0xf73   :  { %1451 = vrot.lane.b32.xlu1 %v3843_v28, %s3455_s2 }
 0xf78   :  { %v1447_v30 = vpop.permute.xlu0 %1446 }
 0xf79   :  { %v3847_v32 = vadd.f32 %v3405_v17, %v1447_v30 }
 0xf7b   :  { %1626 = vrot.lane.b32.xlu0 %v3847_v32, %s3455_s2 }
 0xfe5   :  { %v1452_v35 = vpop.permute.xlu1 %1451 }
 0xfe6   :  { %3041 = vmatmul.mubr.msk.f32.vlgmr.msra.gmra.mrb[12].mxu1 %vm225_vm3, %v1452_v35  ;;  %3052 = vmatmul.mubr.msk.f32.vlgmr.msra.gmra.mrb[22].mxu0 %vm225_vm3, %v1452_v35 }
 0xfe7   :  { %3275 = vmatpush3.bf16.msra.mxu1 %v3659_v63  ;;  %3062 = vmatprep.mubr.msk.f32.mxu1 %vm3453_vm2, %v3454_v8 }
 0xfe8   :  { %3276 = vmatprep.subr.bf16.mxu1 %v3452_v3  ;;  %3281 = vmatpush3.bf16.msra.mxu0 %v3549_v7 }
 0xfe9   :  { %3282 = vmatprep.subr.bf16.mxu0 %v3452_v3  ;;  %3073 = vmatprep.mubr.msk.f32.mxu0 %vm3453_vm2, %v3454_v8 }
 0xfeb   :  { %3278 = vmatpush3.bf16.msra.mxu1 %v3670_v4 }
 0xfec   :  { %3285 = vmatprep.subr.bf16.mxu1 %v3452_v3  ;;  %3284 = vmatpush3.bf16.msra.mxu0 %v3566_v12 }
 0xfed   :  { %v1627_v36 = vpop.permute.xlu0 %1626  ;;  %3291 = vmatprep.subr.bf16.mxu0 %v3452_v3 }
 0xfee   :  { %3063 = vmatmul.mubr.msk.f32.vlgmr.msra.gmra.mrb[14].mxu1 %vm225_vm3, %v1627_v36 }
 0xfef   :  { %3287 = vmatpush3.bf16.msra.mxu1 %v3633_v53  ;;  %3084 = vmatprep.mubr.msk.f32.mxu1 %vm3453_vm2, %v3454_v8 }
 0xff0   :  { %3288 = vmatprep.subr.bf16.mxu1 %v3452_v3 }
 0xff3   :  { %3290 = vmatpush3.bf16.msra.mxu1 %v3639_v55 }
 0xff4   :  { %3297 = vmatprep.subr.bf16.mxu1 %v3452_v3 }
0x10b9   :  { %v1521_v37 = vpop.f32.mrb[12].mxu1  ;;  %v1621_v38 = vpop.f32.mrb[22].mxu0 }
0x10ba   :  { %v1532_v23 = vadd.f32 %v1521_v37, %v3618_v34  ;;  %v3042_v39 = vpop.f32.mrb[13].mxu1  ;;  %v3053_v40 = vpop.f32.mrb[23].mxu0  ;;  %v1525_v44 = vadd.f32 %v1521_v37, %v3610_v27  ;;  %v1622_v25 = vadd.f32 %v3700_v18, %v1621_v38 }
0x10bc   :  { %1534 = vrot.lane.b32.xlu1 %v1532_v23, %s3455_s2  ;;  %v2711_v45 = vmul.f32 -1.442695, %v1525_v44 }
0x10be   :  { %3406 = vpow2.f32 %v2711_v45 }
0x10c1   :  { %v1696_v41 = vpop.f32.mrb[14].mxu1 }
0x10c2   :  { %v1707_v42 = vadd.f32 %v1696_v41, %v3692_v13  ;;  %v3064_v43 = vpop.f32.mrb[15].mxu1  ;;  %v1700_v46 = vadd.f32 %v1696_v41, %v1622_v25 }
0x10c4   :  { %1709 = vrot.lane.b32.xlu0 %v1707_v42, %s3455_s2  ;;  %v2714_v47 = vmul.f32 -1.442695, %v1700_v46 }
0x10c6   :  { %3408 = vpow2.f32 %v2714_v47 }
0x10c8   :  { %v3407_v48 = vpop.eup %3406 }
0x10c9   :  { %v1529_v49 = vadd.f32 1.0, %v3407_v48 }
0x10cb   :  { %3410 = vrcp.f32 %v1529_v49 }
0x10d0   :  { %v3409_v50 = vpop.eup %3408 }
0x10d1   :  { %v1704_v51 = vadd.f32 1.0, %v3409_v50 }
0x10d3   :  { %3412 = vrcp.f32 %v1704_v51 }
0x10d5   :  { %v3411_v52 = vpop.eup %3410 }
0x10dd   :  { %v3413_v56 = vpop.eup %3412 }
0x112e   :  { %v1535_v20 = vpop.permute.xlu1 %1534 }
0x112f   :  { %v1537_v54 = vmul.f32 %v3411_v52, %v1535_v20 }
0x1131   :  { %1539 = vrot.lane.b32.xlu1 %v1537_v54, %s3455_s2 }
0x1136   :  { %v1710_v57 = vpop.permute.xlu0 %1709 }
0x1137   :  { %v1712_v58 = vmul.f32 %v3413_v56, %v1710_v57 }
0x1139   :  { %1714 = vrot.lane.b32.xlu0 %v1712_v58, %s3455_s2 }
0x11a3   :  { %v1540_v59 = vpop.permute.xlu1 %1539 }
0x11a4   :  { %v1542_v60 = vadd.f32 %v1540_v59, %v3610_v27 }
0x11a6   :  { %3414 = vtanh.f32 %v1542_v60 }
0x11ab   :  { %v1715_v61 = vpop.permute.xlu0 %1714 }
0x11ac   :  { %v1717_v62 = vadd.f32 %v1715_v61, %v1622_v25 }
0x11ae   :  { %3416 = vtanh.f32 %v1717_v62 }
0x11b0   :  { %v3415_v0 = vpop.eup %3414 }
0x11b1   :  { %v1544_v1 = vsub.f32 %v3843_v28, %v3415_v0 }
0x11b3   :  { %1546 = vrot.lane.b32.xlu1 %v1544_v1, %s3456_s0 }
0x11b8   :  { %v3417_v2 = vpop.eup %3416 }
0x11b9   :  { %v1719_v5 = vsub.f32 %v3847_v32, %v3417_v2 }
0x11bb   :  { %1721 = vrot.lane.b32.xlu0 %v1719_v5, %s3456_s0 }
0x1225   :  { %v1547_v6 = vpop.permute.xlu1 %1546 }
0x1226   :  { %v1549_v9 = vmul.f32 %v3411_v52, %v1547_v6 }
0x1228   :  { %1551 = vrot.lane.b32.xlu1 %v1549_v9, %s3457_s25 }
0x122d   :  { %v1722_v10 = vpop.permute.xlu0 %1721 }
0x122e   :  { %v1724_v27 = vmul.f32 %v3413_v56, %v1722_v10 }
0x1230   :  { %1726 = vrot.lane.b32.xlu0 %v1724_v27, %s3457_s25 }
0x129a   :  { %v1552_v11 = vpop.permute.xlu1 %1551 }
0x129b   :  { %v3887_v14 = vadd.f32 %v3415_v0, %v1552_v11 }
0x129d   :  { %1731 = vrot.lane.b32.xlu1 %v3887_v14, %s3455_s2 }
0x12a2   :  { %v1727_v15 = vpop.permute.xlu0 %1726 }
0x12a3   :  { %v3891_v16 = vadd.f32 %v3417_v2, %v1727_v15 }
0x12a5   :  { %1906 = vrot.lane.b32.xlu0 %v3891_v16, %s3455_s2 }
0x130f   :  { %v1732_v17 = vpop.permute.xlu1 %1731 }
0x1310   :  { %3074 = vmatmul.mubr.msk.f32.vlgmr.msra.gmra.mrb[24].mxu0 %vm225_vm3, %v1732_v17  ;;  %3085 = vmatmul.mubr.msk.f32.vlgmr.msra.gmra.mrb[16].mxu1 %vm225_vm3, %v1732_v17 }
0x1311   :  { %3293 = vmatpush3.bf16.msra.mxu0 %v3659_v63  ;;  %3095 = vmatprep.mubr.msk.f32.mxu0 %vm3453_vm2, %v3454_v8 }
0x1312   :  { %3294 = vmatprep.subr.bf16.mxu0 %v3452_v3  ;;  %3299 = vmatpush3.bf16.msra.mxu1 %v3549_v7 }
0x1313   :  { %3300 = vmatprep.subr.bf16.mxu1 %v3452_v3  ;;  %3106 = vmatprep.mubr.msk.f32.mxu1 %vm3453_vm2, %v3454_v8 }
0x1315   :  { %3296 = vmatpush3.bf16.msra.mxu0 %v3670_v4 }
0x1316   :  { %3303 = vmatprep.subr.bf16.mxu0 %v3452_v3  ;;  %3302 = vmatpush3.bf16.msra.mxu1 %v3566_v12 }
0x1317   :  { %v1907_v19 = vpop.permute.xlu0 %1906  ;;  %3309 = vmatprep.subr.bf16.mxu1 %v3452_v3 }
0x1318   :  { %3096 = vmatmul.mubr.msk.f32.vlgmr.msra.gmra.mrb[26].mxu0 %vm225_vm3, %v1907_v19 }
0x1319   :  { %3305 = vmatpush3.bf16.msra.mxu0 %v3633_v53  ;;  %3117 = vmatprep.mubr.msk.f32.mxu0 %vm3453_vm2, %v3454_v8 }
0x131a   :  { %3306 = vmatprep.subr.bf16.mxu0 %v3452_v3 }
0x131d   :  { %3308 = vmatpush3.bf16.msra.mxu0 %v3639_v55 }
0x131e   :  { %3315 = vmatprep.subr.bf16.mxu0 %v3452_v3 }
0x13e3   :  { %v1801_v7 = vpop.f32.mrb[24].mxu0  ;;  %v1901_v21 = vpop.f32.mrb[16].mxu1 }
0x13e4   :  { %v1812_v12 = vadd.f32 %v1801_v7, %v3618_v34  ;;  %v3075_v22 = vpop.f32.mrb[25].mxu0  ;;  %v3086_v24 = vpop.f32.mrb[17].mxu1  ;;  %v1805_v30 = vadd.f32 %v1801_v7, %v3616_v33  ;;  %v1902_v35 = vadd.f32 %v3700_v18, %v1901_v21 }
0x13e6   :  { %1814 = vrot.lane.b32.xlu1 %v1812_v12, %s3455_s2  ;;  %v2716_v32 = vmul.f32 -1.442695, %v1805_v30 }
0x13e8   :  { %3418 = vpow2.f32 %v2716_v32 }
0x13eb   :  { %v1976_v29 = vpop.f32.mrb[26].mxu0 }
0x13ec   :  { %v1987_v26 = vadd.f32 %v1976_v29, %v3692_v13  ;;  %v3097_v28 = vpop.f32.mrb[27].mxu0  ;;  %v1980_v36 = vadd.f32 %v1976_v29, %v1902_v35 }
0x13ee   :  { %1989 = vrot.lane.b32.xlu0 %v1987_v26, %s3455_s2  ;;  %v2719_v37 = vmul.f32 -1.442695, %v1980_v36 }
0x13f0   :  { %3420 = vpow2.f32 %v2719_v37 }
0x13f2   :  { %v3419_v38 = vpop.eup %3418 }
0x13f3   :  { %v1809_v23 = vadd.f32 1.0, %v3419_v38 }
0x13f5   :  { %3422 = vrcp.f32 %v1809_v23 }
0x13fa   :  { %v3421_v39 = vpop.eup %3420 }
0x13fb   :  { %v1984_v40 = vadd.f32 1.0, %v3421_v39 }
0x13fd   :  { %3424 = vrcp.f32 %v1984_v40 }
0x13ff   :  { %v3423_v41 = vpop.eup %3422 }
0x1407   :  { %v3425_v44 = vpop.eup %3424 }
0x1458   :  { %v1815_v42 = vpop.permute.xlu1 %1814 }
0x1459   :  { %v1817_v43 = vmul.f32 %v3423_v41, %v1815_v42 }
0x145b   :  { %1819 = vrot.lane.b32.xlu1 %v1817_v43, %s3455_s2 }
0x1460   :  { %v1990_v45 = vpop.permute.xlu0 %1989 }
0x1461   :  { %v1992_v25 = vmul.f32 %v3425_v44, %v1990_v45 }
0x1463   :  { %1994 = vrot.lane.b32.xlu0 %v1992_v25, %s3455_s2 }
0x14cd   :  { %v1820_v46 = vpop.permute.xlu1 %1819 }
0x14ce   :  { %v1822_v47 = vadd.f32 %v1820_v46, %v3616_v33 }
0x14d0   :  { %3426 = vtanh.f32 %v1822_v47 }
0x14d5   :  { %v1995_v48 = vpop.permute.xlu0 %1994 }
0x14d6   :  { %v1997_v49 = vadd.f32 %v1995_v48, %v1902_v35 }
0x14d8   :  { %3428 = vtanh.f32 %v1997_v49 }
0x14da   :  { %v3427_v50 = vpop.eup %3426 }
0x14db   :  { %v1824_v51 = vsub.f32 %v3887_v14, %v3427_v50 }
0x14dd   :  { %1826 = vrot.lane.b32.xlu1 %v1824_v51, %s3456_s0 }
0x14e2   :  { %v3429_v52 = vpop.eup %3428 }
0x14e3   :  { %v1999_v20 = vsub.f32 %v3891_v16, %v3429_v52 }
0x14e5   :  { %2001 = vrot.lane.b32.xlu0 %v1999_v20, %s3456_s0 }
0x154f   :  { %v1827_v54 = vpop.permute.xlu1 %1826 }
0x1550   :  { %v1829_v56 = vmul.f32 %v3423_v41, %v1827_v54 }
0x1552   :  { %1831 = vrot.lane.b32.xlu1 %v1829_v56, %s3457_s25 }
0x1557   :  { %v2002_v57 = vpop.permute.xlu0 %2001 }
0x1558   :  { %v2004_v33 = vmul.f32 %v3425_v44, %v2002_v57 }
0x155a   :  { %2006 = vrot.lane.b32.xlu0 %v2004_v33, %s3457_s25 }
0x15c4   :  { %v1832_v58 = vpop.permute.xlu1 %1831 }
0x15c5   :  { %v3931_v59 = vadd.f32 %v3427_v50, %v1832_v58 }
0x15c7   :  { %2011 = vrot.lane.b32.xlu1 %v3931_v59, %s3455_s2 }
0x15cc   :  { %v2007_v60 = vpop.permute.xlu0 %2006 }
0x15cd   :  { %v3935_v61 = vadd.f32 %v3429_v52, %v2007_v60  ;;  %v2471_v60 = vld [vmem:[%s4050_s9 + $0x8] sm:$0xff] }
0x15cf   :  { %2186 = vrot.lane.b32.xlu0 %v3935_v61, %s3455_s2 }
0x1639   :  { %v2012_v62 = vpop.permute.xlu1 %2011 }
0x163a   :  { %3107 = vmatmul.mubr.msk.f32.vlgmr.msra.gmra.mrb[18].mxu1 %vm225_vm3, %v2012_v62  ;;  %3118 = vmatmul.mubr.msk.f32.vlgmr.msra.gmra.mrb[28].mxu0 %vm225_vm3, %v2012_v62 }
0x163b   :  { %3311 = vmatpush3.bf16.msra.mxu1 %v3659_v63  ;;  %3128 = vmatprep.mubr.msk.f32.mxu1 %vm3453_vm2, %v3454_v8 }
0x163c   :  { %3312 = vmatprep.subr.bf16.mxu1 %v3452_v3  ;;  %3317 = vmatpush3.bf16.msra.mxu0 %v3633_v53 }
0x163d   :  { %3318 = vmatprep.subr.bf16.mxu0 %v3452_v3  ;;  %3139 = vmatprep.mubr.msk.f32.mxu0 %vm3453_vm2, %v3454_v8 }
0x163f   :  { %3314 = vmatpush3.bf16.msra.mxu1 %v3670_v4 }
0x1640   :  { %3320 = vmatpush3.bf16.msra.mxu0 %v3639_v55  ;;  %3321 = vmatprep.subr.bf16.mxu1 %v3452_v3 }
0x1641   :  { %v2187_v0 = vpop.permute.xlu0 %2186  ;;  %3327 = vmatprep.subr.bf16.mxu0 %v3452_v3 }
0x1642   :  { %3129 = vmatmul.mubr.msk.f32.vlgmr.msra.gmra.mrb[20].mxu1 %vm225_vm3, %v2187_v0  ;;  %v2473_v0 = vld [vmem:[%s4050_s9 + $0x18] sm:$0xff] }
0x1643   :  { %3323 = vmatpush3.bf16.msra.mxu1 %v3659_v63  ;;  %3150 = vmatprep.mubr.msk.f32.mxu1 %vm3453_vm2, %v3454_v8 }
0x1644   :  { %3324 = vmatprep.subr.bf16.mxu1 %v3452_v3 }
0x1647   :  { %3326 = vmatpush3.bf16.msra.mxu1 %v3670_v4 }
0x1648   :  { %3333 = vmatprep.subr.bf16.mxu1 %v3452_v3 }
0x170d   :  { %v2081_v53 = vpop.f32.mrb[18].mxu1  ;;  %v2181_v55 = vpop.f32.mrb[28].mxu0 }
0x170e   :  { %v2092_v1 = vadd.f32 %v2081_v53, %v3618_v34  ;;  %v3108_v2 = vpop.f32.mrb[19].mxu1  ;;  %v3119_v5 = vpop.f32.mrb[29].mxu0  ;;  %v2085_v10 = vadd.f32 %v2081_v53, %v3614_v31  ;;  %v2182_v4 = vadd.f32 %v3700_v18, %v2181_v55 }
0x1710   :  { %2094 = vrot.lane.b32.xlu0 %v2092_v1, %s3455_s2  ;;  %v2721_v27 = vmul.f32 -1.442695, %v2085_v10 }
0x1712   :  { %3430 = vpow2.f32 %v2721_v27  ;;  %v2585_v27 = vld [vmem:[%s4051_s11 + $0x10] sm:$0xff] }
0x1715   :  { %v2256_v6 = vpop.f32.mrb[20].mxu1 }
0x1716   :  { %v2267_v63 = vadd.f32 %v2256_v6, %v3692_v13  ;;  %v3130_v9 = vpop.f32.mrb[21].mxu1  ;;  %v2260_v11 = vadd.f32 %v2256_v6, %v2182_v4 }
0x1717   :  { %v2584_v9 = vld [vmem:[%s4051_s11 + $0x8] sm:$0xff] }
0x1718   :  { %2269 = vrot.lane.b32.xlu1 %v2267_v63, %s3455_s2  ;;  %v2724_v14 = vmul.f32 -1.442695, %v2260_v11  ;;  %v2583_v63 = vld [vmem:[%s4051_s11] sm:$0xff] }
0x1719   :  { %v3334_v10 = vpack.c.bf16 %v2584_v9, %v2583_v63 }
0x171a   :  { %3432 = vpow2.f32 %v2724_v14  ;;  %v2587_v14 = vld [vmem:[%s4051_s11 + $0x20] sm:$0xff] }
0x171c   :  { %v3431_v34 = vpop.eup %3430 }
0x171d   :  { %v2089_v15 = vadd.f32 1.0, %v3431_v34  ;;  %v2588_v34 = vld [vmem:[%s4051_s11 + $0x28] sm:$0xff] }
0x171f   :  { %3434 = vrcp.f32 %v2089_v15  ;;  %v3340_v15 = vpack.c.bf16 %v2588_v34, %v2587_v14 }
0x1724   :  { %v3433_v16 = vpop.eup %3432 }
0x1725   :  { %v2264_v17 = vadd.f32 1.0, %v3433_v16  ;;  %v2589_v16 = vld [vmem:[%s4051_s11 + $0x30] sm:$0xff] }
0x1727   :  { %3436 = vrcp.f32 %v2264_v17  ;;  %v2590_v17 = vld [vmem:[%s4051_s11 + $0x38] sm:$0xff] }
0x1729   :  { %v3435_v19 = vpop.eup %3434 }
0x1731   :  { %v3437_v12 = vpop.eup %3436 }
0x1782   :  { %v2095_v7 = vpop.permute.xlu0 %2094 }
0x1783   :  { %v2097_v21 = vmul.f32 %v3435_v19, %v2095_v7  ;;  %v2728_v7 = vld [vmem:[%s4052_s10] ss:$0 sm:$0xff] }
0x1785   :  { %2099 = vrot.lane.b32.xlu0 %v2097_v21, %s3455_s2 }
0x178a   :  { %v2270_v22 = vpop.permute.xlu1 %2269 }
0x178b   :  { %v2272_v24 = vmul.f32 %v3437_v12, %v2270_v22 }
0x178d   :  { %2274 = vrot.lane.b32.xlu1 %v2272_v24, %s3455_s2 }
0x17f7   :  { %v2100_v29 = vpop.permute.xlu0 %2099 }
0x17f8   :  { %v2102_v26 = vadd.f32 %v2100_v29, %v3614_v31 }
0x17fa   :  { %3438 = vtanh.f32 %v2102_v26 }
0x17ff   :  { %v2275_v28 = vpop.permute.xlu1 %2274 }
0x1800   :  { %v2277_v30 = vadd.f32 %v2275_v28, %v2182_v4  ;;  %v2586_v4 = vld [vmem:[%s4051_s11 + $0x18] sm:$0xff] }
0x1801   :  { %v3337_v11 = vpack.c.bf16 %v2586_v4, %v2585_v27 }
0x1802   :  { %3440 = vtanh.f32 %v2277_v30 }
0x1804   :  { %v3439_v32 = vpop.eup %3438 }
0x1805   :  { %v2104_v35 = vsub.f32 %v3931_v59, %v3439_v32 }
0x1807   :  { %2106 = vrot.lane.b32.xlu0 %v2104_v35, %s3456_s0 }
0x180c   :  { %v3441_v36 = vpop.eup %3440 }
0x180d   :  { %v2279_v37 = vsub.f32 %v3935_v61, %v3441_v36  ;;  %v2472_v61 = vld [vmem:[%s4050_s9 + $0x10] sm:$0xff] }
0x180e   :  { %v3331_v53 = vpack.c.bf16 %v2473_v0, %v2472_v61 }
0x180f   :  { %2281 = vrot.lane.b32.xlu1 %v2279_v37, %s3456_s0 }
0x1879   :  { %v2107_v38 = vpop.permute.xlu0 %2106 }
0x187a   :  { %v2109_v23 = vmul.f32 %v3435_v19, %v2107_v38  ;;  %v3343_v19 = vpack.c.bf16 %v2590_v17, %v2589_v16 }
0x187c   :  { %2111 = vrot.lane.b32.xlu0 %v2109_v23, %s3457_s25 }
0x1881   :  { %v2282_v39 = vpop.permute.xlu1 %2281 }
0x1882   :  { %v2284_v31 = vmul.f32 %v3437_v12, %v2282_v39 }
0x1884   :  { %2286 = vrot.lane.b32.xlu1 %v2284_v31, %s3457_s25 }
0x18ee   :  { %v2112_v40 = vpop.permute.xlu0 %2111 }
0x18ef   :  { %v2114_v41 = vadd.f32 %v3439_v32, %v2112_v40 }
0x18f1   :  { %2291 = vrot.lane.b32.xlu0 %v2114_v41, %s3455_s2 }
0x18f6   :  { %v2287_v42 = vpop.permute.xlu1 %2286 }
0x18f7   :  { %v2289_v43 = vadd.f32 %v3441_v36, %v2287_v42 }
0x18f9   :  { %2366 = vrot.lane.b32.xlu1 %v2289_v43, %s3455_s2 }
0x1963   :  { %v2292_v44 = vpop.permute.xlu0 %2291 }
0x1964   :  { %3140 = vmatmul.mubr.msk.f32.vlgmr.msra.gmra.mrb[30].mxu0 %vm225_vm3, %v2292_v44 }
0x1965   :  { %3161 = vmatprep.mubr.msk.f32.mxu0 %vm3453_vm2, %v3454_v8 }
0x196b   :  { %v2367_v45 = vpop.permute.xlu1 %2366 }
0x196c   :  { %3151 = vmatmul.mubr.msk.f32.vlgmr.msra.gmra.mrb[22].mxu1 %vm225_vm3, %v2367_v45 }
0x196d   :  { %3180 = vmatprep.mubr.msk.f32.mxu1 %vm3453_vm2, %v3454_v8  ;;  %3335 = vmatpush3.bf16.msra.mxu1 %v3334_v10 }
0x196e   :  { %3336 = vmatprep.subr.bf16.mxu1 %v3452_v3 }
0x1971   :  { %3338 = vmatpush3.bf16.msra.mxu1 %v3337_v11 }
0x1972   :  { %3339 = vmatprep.subr.bf16.mxu1 %v3452_v3 }
0x1975   :  { %3341 = vmatpush3.bf16.msra.mxu1 %v3340_v15 }
0x1976   :  { %3342 = vmatprep.subr.bf16.mxu1 %v3452_v3 }
0x1979   :  { %3344 = vmatpush3.bf16.msra.mxu1 %v3343_v19 }
0x1a37   :  { %v2361_v25 = vpop.f32.mrb[30].mxu0 }
0x1a38   :  { %v3141_v46 = vpop.f32.mrb[31].mxu0  ;;  %v2362_v50 = vadd.f32 %v3700_v18, %v2361_v25  ;;  %v2470_v18 = vld [vmem:[%s4050_s9] sm:$0xff]  ;;  %v3458_v25 = vmov -1.0  }
0x1a39   :  { %v3328_v62 = vpack.c.bf16 %v2471_v60, %v2470_v18 }
0x1a3b   :  { %3329 = vmatpush3.bf16.msra.mxu0 %v3328_v62 }
0x1a3c   :  { %3330 = vmatprep.subr.bf16.mxu0 %v3452_v3 }
0x1a3f   :  { %v2436_v47 = vpop.f32.mrb[22].mxu1  ;;  %3332 = vmatpush3.bf16.msra.mxu0 %v3331_v53 }
0x1a40   :  { %v2447_v48 = vadd.f32 %v2436_v47, %v3692_v13  ;;  %v3152_v49 = vpop.f32.mrb[23].mxu1  ;;  %v2440_v51 = vadd.f32 %v2436_v47, %v2362_v50 }
0x1a42   :  { %2449 = vrot.lane.b32.xlu1 %v2447_v48, %s3455_s2  ;;  %v2727_v52 = vmul.f32 -1.442695, %v2440_v51  ;;  %v2730_v51 = vld [vmem:[%s4053_s12] ss:$0 sm:$0xff] }
0x1a44   :  { %3442 = vpow2.f32 %v2727_v52 }
0x1a4e   :  { %v3443_v20 = vpop.eup %3442 }
0x1a4f   :  { %v2444_v54 = vadd.f32 1.0, %v3443_v20 }
0x1a51   :  { %3444 = vrcp.f32 %v2444_v54 }
0x1a5b   :  { %v3445_v56 = vpop.eup %3444 }
0x1ab4   :  { %v2450_v57 = vpop.permute.xlu1 %2449 }
0x1ab5   :  { %v2452_v33 = vmul.f32 %v3445_v56, %v2450_v57 }
0x1ab7   :  { %2454 = vrot.lane.b32.xlu0 %v2452_v33, %s3455_s2 }
0x1b29   :  { %v2455_v8 = vpop.permute.xlu0 %2454 }
0x1b2a   :  { %v2457_v58 = vadd.f32 %v2455_v8, %v2362_v50 }
0x1b2c   :  { %3446 = vtanh.f32 %v2457_v58 }
0x1b36   :  { %v3447_v13 = vpop.eup %3446 }
0x1b37   :  { %v2459_v59 = vsub.f32 %v2289_v43, %v3447_v13 }
0x1b39   :  { %2461 = vrot.lane.b32.xlu1 %v2459_v59, %s3456_s0 }
0x1bab   :  { %v2462_v55 = vpop.permute.xlu1 %2461 }
0x1bac   :  { %v2464_v1 = vmul.f32 %v3445_v56, %v2462_v55 }
0x1bae   :  { %2466 = vrot.lane.b32.xlu0 %v2464_v1, %s3457_s25 }
0x1c20   :  { %v2467_v2 = vpop.permute.xlu0 %2466 }
0x1c21   :  { %v2469_v5 = vadd.f32 %v3447_v13, %v2467_v2 }
0x1c23   :  { %2482 = vrot.lane.b32.xlu1 %v2469_v5, %s3455_s2 }
0x1c95   :  { %v2483_v6 = vpop.permute.xlu1 %2482 }
0x1c96   :  { %3162 = vmatmul.mubr.msk.f32.vlgmr.msra.gmra.mrb[32].mxu0 %vm225_vm3, %v2483_v6 }
0x1d69   :  { %v2552_v21 = vpop.f32.mrb[32].mxu0 }
0x1d6a   :  { %v2553_v12 = vadd.f32 %v2728_v7, %v2552_v21  ;;  %v3163_v22 = vpop.f32.mrb[33].mxu0 }
0x1d6c   :  { %v2557_v24 = vmul.f32 0.70710677, %v2553_v12  ;;  %v2556_v48 = vmul.f32 0.5, %v2553_v12 }
0x1d6e   :  { %v2560_v29 = vand.u32 2147483647, %v2557_v24  ;;  %vm2558_vm4 = vcmp.ge.f32.partialorder %v2557_v24, 0.0 }
0x1d6f   :  { %v2559_v46 = vsel %vm2558_vm4, 1.0, %v3458_v25 }
0x1d70   :  { %v2561_v3 = vmul.f32 0.3275911, %v2560_v29  ;;  %v2574_v28 = vsub.f32 0.0, %v2560_v29 }
0x1d72   :  { %v2562_v26 = vadd.f32 1.0, %v2561_v3  ;;  %v2575_v32 = vmul.f32 %v2574_v28, %v2560_v29 }
0x1d74   :  { %3448 = vrcp.f32 %v2562_v26  ;;  %v2576_v37 = vmul.f32 1.442695, %v2575_v32 }
0x1d76   :  { %3450 = vpow2.f32 %v2576_v37 }
0x1d7e   :  { %v3449_v30 = vpop.eup %3448 }
0x1d7f   :  { %v2565_v35 = vmul.f32 1.0614054, %v3449_v30 }
0x1d80   :  { %v3451_v43 = vpop.eup %3450 }
0x1d81   :  { %v2566_v36 = vadd.f32 -1.4531521, %v2565_v35 }
0x1d83   :  { %v2567_v38 = vmul.f32 %v3449_v30, %v2566_v36 }
0x1d85   :  { %v2568_v23 = vadd.f32 1.4214138, %v2567_v38 }
0x1d87   :  { %v2569_v39 = vmul.f32 %v3449_v30, %v2568_v23 }
0x1d89   :  { %v2570_v31 = vadd.f32 -0.28449672, %v2569_v39 }
0x1d8b   :  { %v2571_v40 = vmul.f32 %v3449_v30, %v2570_v31 }
0x1d8d   :  { %v2572_v41 = vadd.f32 0.2548296, %v2571_v40 }
0x1d8f   :  { %v2573_v42 = vmul.f32 %v3449_v30, %v2572_v41 }
0x1d91   :  { %v2578_v44 = vmul.f32 %v3451_v43, %v2573_v42 }
0x1d93   :  { %v2579_v45 = vsub.f32 1.0, %v2578_v44 }
0x1d95   :  { %v2580_v47 = vmul.f32 %v2579_v45, %v2559_v46 }
0x1d97   :  { %v2581_v49 = vadd.f32 1.0, %v2580_v47 }
0x1d99   :  { %v2582_v50 = vmul.f32 %v2581_v49, %v2556_v48 }
0x1d9b   :  { %3181 = vmatmul.mubr.msk.f32.vlgmr.msra.gmra.mrb[24].mxu1 %vm2598_vm5, %v2582_v50 }
0x1e6e   :  { %v2668_v52 = vpop.f32.mrb[24].mxu1 }
0x1e6f   :  { %v2669_v20 = vadd.f32 %v2730_v51, %v2668_v52  ;;  %v3182_v54 = vpop.f32.mrb[25].mxu1 }
0x1e71   :  { %2672 = vst.msk [vmem:[%s4054_s13] sm:$0xff] %vm91_vm1, %v2669_v20 }

</bundles_post_ra>
